<compile_context>
chip_gen: v7x
topology: tpu7x:2x2x1
jax: 0.10.0
libtpu: 0.0.40
codegen_flags: <defaults>
</compile_context>

<pallas_src>
import functools
import math

import jax
import jax.numpy as jnp
from jax.experimental import pallas as pl
from jax.experimental.pallas import tpu as pltpu

LAYER_NORM_EPS = 1e-12  # ParlAI LAYER_NORM_EPS
NEG_INF = -1e20         # ParlAI neginf(float32)


# ---------------------------------------------------------------------------
# Pallas kernel: full encoder stack (all layers), one batch block per grid row
# ---------------------------------------------------------------------------
def _layer_norm(x, gamma, beta):
    # single-pass statistics: var = E[x^2] - E[x]^2 (one XLU reduction pair)
    mean = jnp.mean(x, axis=-1, keepdims=True)
    mean2 = jnp.mean(x * x, axis=-1, keepdims=True)
    var = mean2 - mean * mean
    return (x - mean) * jax.lax.rsqrt(var + LAYER_NORM_EPS) * gamma + beta


def encoder_stack_kernel(n_heads,
                         x_ref, bias_ref,
                         wqkv_ref, wo_ref, w1_ref, w2_ref, vec_ref,
                         out_ref, act_ref):
    """grid = (batch_blocks, n_layers).

    act_ref : VMEM scratch (bb*T, D) f32 -- the running activation, resident across
              the layer axis; re-initialised under pl.when(layer==0) for EVERY batch
              block (scratch persists across grid iterations).
    out_ref : (bb, 1, D) -- only the first-token representation, written on the
              last layer.
    """
    layer = pl.program_id(1)
    n_layers = pl.num_programs(1)
    Bb, T, D = x_ref.shape
    H = n_heads
    hd = D // H
    M = Bb * T
    F = w1_ref.shape[1]

    @pl.when(layer == 0)
    def _():
        act_ref[...] = x_ref[...].reshape(M, D)

    x2 = act_ref[...]                                   # (M, D) f32
    bias4 = bias_ref[...][:, None, :, :]                # (Bb, 1, 1, T) additive bias

    # packed per-layer small vectors: one (8, W) tile, static row/width slices
    bqkv = vec_ref[0:1, :3 * D]                         # (1, 3D)
    bo   = vec_ref[1:2, :D]
    g1   = vec_ref[2:3, :D]
    be1  = vec_ref[3:4, :D]
    b1   = vec_ref[4:5, :F]
    b2   = vec_ref[5:6, :D]
    g2   = vec_ref[6:7, :D]
    be2  = vec_ref[7:8, :D]

    # --- fused QKV: one (M, D) @ (D, 3D) bf16 GEMM; 1/sqrt(hd) folded into Q ---
    qkv = jnp.dot(x2.astype(jnp.bfloat16), wqkv_ref[...],
                  preferred_element_type=jnp.float32) + bqkv

    def split_heads(t):                                 # (M, D) f32 -> (Bb*H, T, hd)
        t = t.reshape(Bb, T, H, hd)
        t = jnp.transpose(t, (0, 2, 1, 3))
        return t.reshape(Bb * H, T, hd)

    q = split_heads(qkv[:, :D]).astype(jnp.bfloat16)
    k = split_heads(qkv[:, D:2 * D]).astype(jnp.bfloat16)
    v = split_heads(qkv[:, 2 * D:]).astype(jnp.bfloat16)

    # --- all heads in ONE pair of batched matmuls (batch dim = Bb*H) ----------
    s = jnp.einsum('ntd,nsd->nts', q, k,
                   preferred_element_type=jnp.float32)          # (Bb*H, T, T)
    s = s.reshape(Bb, H, T, T) + bias4
    s = s - jnp.max(s, axis=-1, keepdims=True)
    p = jnp.exp(s)
    p = p * pl.reciprocal(jnp.sum(p, axis=-1, keepdims=True), approx=True)
    p = p.reshape(Bb * H, T, T).astype(jnp.bfloat16)
    o = jnp.einsum('nts,nsd->ntd', p, v,
                   preferred_element_type=jnp.float32)          # (Bb*H, T, hd)
    attn = jnp.transpose(o.reshape(Bb, H, T, hd), (0, 2, 1, 3)).reshape(M, D)

    # --- single output projection, K = D ---------------------------------------
    attn_out = jnp.dot(attn.astype(jnp.bfloat16), wo_ref[...],
                       preferred_element_type=jnp.float32) + bo

    # residual + post-LN (aiayn variant)
    y = _layer_norm(x2 + attn_out, g1, be1)

    # --- feed-forward: two flat bf16 GEMMs, relu --------------------------------
    h1 = jnp.dot(y.astype(jnp.bfloat16), w1_ref[...],
                 preferred_element_type=jnp.float32) + b1
    h1 = jnp.maximum(h1, 0.0)
    ff = jnp.dot(h1.astype(jnp.bfloat16), w2_ref[...],
                 preferred_element_type=jnp.float32) + b2

    y = _layer_norm(y + ff, g2, be2)
    act_ref[...] = y
    # ParlAI re-zeroes padded rows after every layer; padded keys are masked by
    # the attention bias and padded rows never feed the 'first' output, so the
    # per-layer multiply is dropped (changes padded intermediates only).

    @pl.when(layer == n_layers - 1)
    def _():
        out_ref[...] = y.reshape(Bb, T, D)[:, 0:1, :]


# ---------------------------------------------------------------------------
# bb / VMEM sizing
# ---------------------------------------------------------------------------
def _vmem_capacity_bytes():
    try:
        return int(pltpu.get_tpu_info().vmem_capacity_bytes)
    except Exception:
        return 64 * 1024 * 1024   # conservative (v7x per-TensorCore)


def _estimate_vmem_bytes(bb, T, D, F, W, n_heads):
    weights = 2 * 2 * (D * 3 * D + D * D + D * F + F * D)   # double-buffered bf16
    vecs = 2 * 4 * 8 * W
    io = 2 * 4 * (bb * T * D + bb * T + bb * D)              # x, bias, out (f32, x2)
    scratch = 4 * bb * T * D                                  # resident activation
    interm = 4 * bb * (T * (3 * D + F + 2 * D) + 2 * n_heads * T * T)
    return weights + vecs + io + scratch + interm


def _choose_batch_block(B, T, D, F, W, n_heads, vmem_budget):
    divisors = [d for d in range(1, B + 1) if B % d == 0]
    fitting = [d for d in divisors
               if _estimate_vmem_bytes(d, T, D, F, W, n_heads) <= vmem_budget] or [1]
    bb = fitting[-1]                       # largest block that fits the VMEM budget
    target = max(1, -(-256 // T))          # M = bb*T ~ 256 rows is plenty for the MXU
    for d in fitting:
        if d >= target:
            bb = d
            break
    # keep >= 2 batch blocks (megacore / v7x 2 TCs) when M stays >= 128
    if B // bb < 2:
        for d in reversed(fitting):
            if B // d >= 2 and d * T >= 128:
                bb = d
                break
    return bb


# ---------------------------------------------------------------------------
# Wrapper: one pallas_call for the whole encoder stack
# ---------------------------------------------------------------------------
def run_encoder_stack(x, attn_bias, packed, n_heads, batch_block=None):
    B, T, D = x.shape
    L = packed['wqkv'].shape[0]
    F = packed['w1'].shape[2]
    W = packed['vec'].shape[2]
    assert D % n_heads == 0

    budget = int(_vmem_capacity_bytes() * 0.85)
    bb = batch_block or _choose_batch_block(B, T, D, F, W, n_heads, budget)
    assert B % bb == 0
    est = _estimate_vmem_bytes(bb, T, D, F, W, n_heads)
    vmem_limit = int(min(budget, max(2 * est, 24 * 1024 * 1024)))

    act_map = lambda b, l: (b, 0, 0)   # activations: indexed by batch block only
    w_map = lambda b, l: (l, 0, 0)     # weights: indexed by layer only

    kernel = functools.partial(encoder_stack_kernel, n_heads)
    out = pl.pallas_call(
        kernel,
        out_shape=jax.ShapeDtypeStruct((B, 1, D), jnp.float32),
        grid_spec=pltpu.PrefetchScalarGridSpec(
            num_scalar_prefetch=0,
            grid=(B // bb, L),
            in_specs=[
                pl.BlockSpec((bb, T, D), act_map),        # embedded input
                pl.BlockSpec((bb, 1, T), act_map),        # additive key-padding bias
                pl.BlockSpec((None, D, 3 * D), w_map),    # wqkv (bf16, scale folded)
                pl.BlockSpec((None, D, D), w_map),        # wo (bf16)
                pl.BlockSpec((None, D, F), w_map),        # w1 (bf16)
                pl.BlockSpec((None, F, D), w_map),        # w2 (bf16)
                pl.BlockSpec((None, 8, W), w_map),        # packed biases / LN params
            ],
            out_specs=pl.BlockSpec((bb, 1, D), act_map),
            scratch_shapes=[pltpu.VMEM((bb * T, D), jnp.float32)],  # resident activation
        ),
        compiler_params=pltpu.CompilerParams(
            dimension_semantics=("parallel", "arbitrary"),
            vmem_limit_bytes=vmem_limit,
        ),
    )(x, attn_bias,
      packed['wqkv'], packed['wo'], packed['w1'], packed['w2'], packed['vec'])
    return out[:, 0, :]                                   # (B, D) first-token repr


# ---------------------------------------------------------------------------
# Parameter construction (deterministic, synthetic) + packing
# ---------------------------------------------------------------------------
def sinusoidal_position_codes(n_pos, dim):
    pos = jnp.arange(n_pos, dtype=jnp.float32)[:, None]
    j = jnp.arange(dim // 2, dtype=jnp.float32)[None, :]
    enc = pos / jnp.power(10000.0, 2.0 * j / dim)
    out = jnp.zeros((n_pos, dim), dtype=jnp.float32)
    out = out.at[:, 0::2].set(jnp.sin(enc))
    out = out.at[:, 1::2].set(jnp.cos(enc))
    return out


def pack_layer_params(layers, n_heads):
    """Stack per-layer params; fuse QKV; fold attention scale; pack small vectors."""
    D = layers[0]['wq'].shape[0]
    F = layers[0]['w1'].shape[1]
    hd = D // n_heads
    inv_scale = 1.0 / math.sqrt(hd)
    W = max(3 * D, F)

    def stack_w(fn, dtype):
        return jnp.stack([fn(lp) for lp in layers], axis=0).astype(dtype)

    def vec_rows(lp):
        rows = [
            jnp.concatenate([lp['bq'] * inv_scale, lp['bk'], lp['bv']], axis=1),
            lp['bo'], lp['g1'], lp['be1'], lp['b1'], lp['b2'], lp['g2'], lp['be2'],
        ]
        rows = [jnp.pad(r, ((0, 0), (0, W - r.shape[1]))) for r in rows]
        return jnp.concatenate(rows, axis=0)              # (8, W)

    return dict(
        wqkv=stack_w(lambda lp: jnp.concatenate(
            [lp['wq'] * inv_scale, lp['wk'], lp['wv']], axis=1), jnp.bfloat16),
        wo=stack_w(lambda lp: lp['wo'], jnp.bfloat16),
        w1=stack_w(lambda lp: lp['w1'], jnp.bfloat16),
        w2=stack_w(lambda lp: lp['w2'], jnp.bfloat16),
        vec=jnp.stack([vec_rows(lp) for lp in layers], axis=0),   # (L, 8, W) f32
    )


def init_params(key, vocab, D, F, n_layers, n_positions, n_segments, null_idx, n_heads):
    keys = jax.random.split(key, 4 + n_layers)
    tok_emb = jax.random.normal(keys[0], (vocab, D), jnp.float32) * (D ** -0.5)
    tok_emb = tok_emb.at[null_idx].set(0.0)                   # padding_idx row
    seg_emb = jax.random.normal(keys[1], (n_segments, D), jnp.float32) * (D ** -0.5)
    pos_emb = sinusoidal_position_codes(n_positions, D)       # learn_positional_embeddings=False

    layers = []
    for li in range(n_layers):
        lk = jax.random.split(keys[4 + li], 8)
        s = 0.02
        layers.append(dict(
            wq=jax.random.normal(lk[0], (D, D), jnp.float32) * s,
            bq=jnp.zeros((1, D), jnp.float32),
            wk=jax.random.normal(lk[1], (D, D), jnp.float32) * s,
            bk=jnp.zeros((1, D), jnp.float32),
            wv=jax.random.normal(lk[2], (D, D), jnp.float32) * s,
            bv=jnp.zeros((1, D), jnp.float32),
            wo=jax.random.normal(lk[3], (D, D), jnp.float32) * s,
            bo=jnp.zeros((1, D), jnp.float32),
            g1=jnp.ones((1, D), jnp.float32),
            be1=jnp.zeros((1, D), jnp.float32),
            w1=jax.random.normal(lk[4], (D, F), jnp.float32) * s,
            b1=jnp.zeros((1, F), jnp.float32),
            w2=jax.random.normal(lk[5], (F, D), jnp.float32) * s,
            b2=jnp.zeros((1, D), jnp.float32),
            g2=jnp.ones((1, D), jnp.float32),
            be2=jnp.zeros((1, D), jnp.float32),
        ))

    lin_w = jax.random.normal(keys[2], (D, 1), jnp.float32) * 0.02
    lin_b = jnp.zeros((1, 1), jnp.float32)
    return dict(tok_emb=tok_emb, seg_emb=seg_emb, pos_emb=pos_emb,
                packed=pack_layer_params(layers, n_heads),
                lin_w=lin_w, lin_b=lin_b)


# ---------------------------------------------------------------------------
# CrossEncoderModule.forward(tokens, segments)
# ---------------------------------------------------------------------------
def cross_encoder_forward(params, tokens, segments, null_idx, n_heads):
    B, T = tokens.shape
    D = params['tok_emb'].shape[1]

    mask = (tokens != null_idx)
    maskf = mask.astype(jnp.float32)

    # embeddings (glue: gathers / cumsum in plain JAX)
    x = jnp.take(params['tok_emb'], tokens, axis=0)            # (B, T, D)
    x = x * jnp.sqrt(jnp.float32(D))                           # embeddings_scale
    positions = jnp.clip(jnp.cumsum(mask.astype(jnp.int32), axis=1) - 1, 0, None)
    x = x + jnp.take(params['pos_emb'], positions, axis=0)
    x = x + jnp.take(params['seg_emb'], segments, axis=0)      # n_segments=2
    x = x * maskf[:, :, None]

    # additive key-padding bias, computed once for all layers
    attn_bias = (1.0 - maskf)[:, None, :] * NEG_INF            # (B, 1, T)

    # full transformer encoder stack in ONE Pallas kernel; emits first token only
    first = run_encoder_stack(x, attn_bias, params['packed'], n_heads)  # (B, D)

    # output_scaling = 1.0 ; reduction_type = 'first'
    # Final nn.Linear(D, 1) in plain JAX (lane-width-1 GEMV is a degenerate kernel).
    return first @ params['lin_w'] + params['lin_b']           # (B, 1)


# ---------------------------------------------------------------------------
if __name__ == "__main__":
    # small opt: embedding_size=32, n_heads=2, n_layers=2, ffn_size=64,
    # vocab=64, n_positions=16, n_segments=2, null_idx=0
    VOCAB, D, F = 64, 32, 64
    N_HEADS, N_LAYERS = 2, 2
    N_POS, N_SEG = 16, 2
    NULL_IDX = 0
    B, T = 2, 8

    key = jax.random.PRNGKey(0)
    pkey, tkey = jax.random.split(key)
    params = init_params(pkey, VOCAB, D, F, N_LAYERS, N_POS, N_SEG, NULL_IDX, N_HEADS)

    tokens = jax.random.randint(tkey, (B, T), 1, VOCAB, dtype=jnp.int32)
    tokens = tokens.at[1, -2:].set(NULL_IDX)                   # some padding
    segments = jnp.concatenate(
        [jnp.zeros((B, T // 2), jnp.int32), jnp.ones((B, T - T // 2), jnp.int32)],
        axis=1)

    res = cross_encoder_forward(params, tokens, segments, NULL_IDX, N_HEADS)
    res = jax.block_until_ready(res)
    assert res.shape == (B, 1) and res.dtype == jnp.float32
    assert bool(jnp.all(jnp.isfinite(res)))
    print("KERNEL_OK")
</pallas_src>

<mosaic_0001>
module attributes {stable_mosaic.version = 11 : i64} {
  func.func @encoder_stack_kernel(%arg0: i32, %arg1: i32, %arg2: memref<2x8x32xf32, #tpu.memory_space<vmem>>, %arg3: memref<2x1x8xf32, #tpu.memory_space<vmem>>, %arg4: memref<1x32x96xbf16, #tpu.memory_space<vmem>>, %arg5: memref<1x32x32xbf16, #tpu.memory_space<vmem>>, %arg6: memref<1x32x64xbf16, #tpu.memory_space<vmem>>, %arg7: memref<1x64x32xbf16, #tpu.memory_space<vmem>>, %arg8: memref<1x8x96xf32, #tpu.memory_space<vmem>>, %arg9: memref<2x1x32xf32, #tpu.memory_space<vmem>>, %arg10: memref<16x32xf32, #tpu.memory_space<vmem>>) attributes {dimension_semantics = [#tpu.dimension_semantics<parallel>, #tpu.dimension_semantics<arbitrary>], iteration_bounds = array<i64: 1, 2>, scalar_prefetch = 0 : i64, scratch_operands = 1 : i64, tpu.core_type = #tpu.core_type<tc>, window_params = [{transform_indices = @transform_0, window_bounds = array<i64: 2, 8, 32>}, {transform_indices = @transform_1, window_bounds = array<i64: 2, 1, 8>}, {transform_indices = @transform_2, window_bounds = array<i64: 1, 32, 96>}, {transform_indices = @transform_3, window_bounds = array<i64: 1, 32, 32>}, {transform_indices = @transform_4, window_bounds = array<i64: 1, 32, 64>}, {transform_indices = @transform_5, window_bounds = array<i64: 1, 64, 32>}, {transform_indices = @transform_6, window_bounds = array<i64: 1, 8, 96>}, {transform_indices = @transform_7, window_bounds = array<i64: 2, 1, 32>}]} {
    %c0_i32 = arith.constant 0 : i32
    %0 = arith.cmpi eq, %arg1, %c0_i32 : i32
    %1 = arith.extui %0 : i1 to i32
    %c0_i32_0 = arith.constant 0 : i32
    %2 = arith.cmpi ne, %1, %c0_i32_0 : i32
    scf.if %2 {
      %c0_55 = arith.constant 0 : index
      %c0_56 = arith.constant 0 : index
      %c0_57 = arith.constant 0 : index
      %133 = vector.load %arg2[%c0_55, %c0_56, %c0_57] : memref<2x8x32xf32, #tpu.memory_space<vmem>>, vector<2x8x32xf32>
      %134 = vector.shape_cast %133 : vector<2x8x32xf32> to vector<16x32xf32>
      %c0_58 = arith.constant 0 : index
      %c0_59 = arith.constant 0 : index
      %135 = vector.load %arg10[%c0_58, %c0_59] : memref<16x32xf32, #tpu.memory_space<vmem>>, vector<16x32xf32>
      tpu.vector_store %arg10[%c0_58, %c0_59], %134 {strides = array<i32>} : memref<16x32xf32, #tpu.memory_space<vmem>>, vector<16x32xf32>,
    } else {
    }
    %c0 = arith.constant 0 : index
    %c0_1 = arith.constant 0 : index
    %3 = vector.load %arg10[%c0, %c0_1] : memref<16x32xf32, #tpu.memory_space<vmem>>, vector<16x32xf32>
    %c0_2 = arith.constant 0 : index
    %c0_3 = arith.constant 0 : index
    %c0_4 = arith.constant 0 : index
    %4 = vector.load %arg3[%c0_2, %c0_3, %c0_4] : memref<2x1x8xf32, #tpu.memory_space<vmem>>, vector<2x1x8xf32>
    %5 = vector.shape_cast %4 : vector<2x1x8xf32> to vector<2x1x1x8xf32>
    %c0_5 = arith.constant 0 : index
    %c0_6 = arith.constant 0 : index
    %c0_7 = arith.constant 0 : index
    %6 = vector.load %arg8[%c0_5, %c0_6, %c0_7] : memref<1x8x96xf32, #tpu.memory_space<vmem>>, vector<1x1x96xf32>
    %7 = vector.shape_cast %6 : vector<1x1x96xf32> to vector<1x96xf32>
    %c0_8 = arith.constant 0 : index
    %c1 = arith.constant 1 : index
    %c0_9 = arith.constant 0 : index
    %8 = vector.load %arg8[%c0_8, %c1, %c0_9] : memref<1x8x96xf32, #tpu.memory_space<vmem>>, vector<1x1x32xf32>
    %9 = vector.shape_cast %8 : vector<1x1x32xf32> to vector<1x32xf32>
    %c0_10 = arith.constant 0 : index
    %c2 = arith.constant 2 : index
    %c0_11 = arith.constant 0 : index
    %10 = vector.load %arg8[%c0_10, %c2, %c0_11] : memref<1x8x96xf32, #tpu.memory_space<vmem>>, vector<1x1x32xf32>
    %11 = vector.shape_cast %10 : vector<1x1x32xf32> to vector<1x32xf32>
    %c0_12 = arith.constant 0 : index
    %c3 = arith.constant 3 : index
    %c0_13 = arith.constant 0 : index
    %12 = vector.load %arg8[%c0_12, %c3, %c0_13] : memref<1x8x96xf32, #tpu.memory_space<vmem>>, vector<1x1x32xf32>
    %13 = vector.shape_cast %12 : vector<1x1x32xf32> to vector<1x32xf32>
    %c0_14 = arith.constant 0 : index
    %c4 = arith.constant 4 : index
    %c0_15 = arith.constant 0 : index
    %14 = vector.load %arg8[%c0_14, %c4, %c0_15] : memref<1x8x96xf32, #tpu.memory_space<vmem>>, vector<1x1x64xf32>
    %15 = vector.shape_cast %14 : vector<1x1x64xf32> to vector<1x64xf32>
    %c0_16 = arith.constant 0 : index
    %c5 = arith.constant 5 : index
    %c0_17 = arith.constant 0 : index
    %16 = vector.load %arg8[%c0_16, %c5, %c0_17] : memref<1x8x96xf32, #tpu.memory_space<vmem>>, vector<1x1x32xf32>
    %17 = vector.shape_cast %16 : vector<1x1x32xf32> to vector<1x32xf32>
    %c0_18 = arith.constant 0 : index
    %c6 = arith.constant 6 : index
    %c0_19 = arith.constant 0 : index
    %18 = vector.load %arg8[%c0_18, %c6, %c0_19] : memref<1x8x96xf32, #tpu.memory_space<vmem>>, vector<1x1x32xf32>
    %19 = vector.shape_cast %18 : vector<1x1x32xf32> to vector<1x32xf32>
    %c0_20 = arith.constant 0 : index
    %c7 = arith.constant 7 : index
    %c0_21 = arith.constant 0 : index
    %20 = vector.load %arg8[%c0_20, %c7, %c0_21] : memref<1x8x96xf32, #tpu.memory_space<vmem>>, vector<1x1x32xf32>
    %21 = vector.shape_cast %20 : vector<1x1x32xf32> to vector<1x32xf32>
    %22 = arith.truncf %3 : vector<16x32xf32> to vector<16x32xbf16>
    %c0_22 = arith.constant 0 : index
    %c0_23 = arith.constant 0 : index
    %c0_24 = arith.constant 0 : index
    %23 = vector.load %arg4[%c0_22, %c0_23, %c0_24] : memref<1x32x96xbf16, #tpu.memory_space<vmem>>, vector<1x32x96xbf16>
    %24 = vector.shape_cast %23 : vector<1x32x96xbf16> to vector<32x96xbf16>
    %cst = arith.constant dense<0.000000e+00> : vector<16x96xf32>
    %25 = tpu.matmul %22, %24, %cst {dimension_numbers = #tpu.dot_dimension_numbers<[1], [0], [0], [1], [0, 0, 1, 1], [], []>} : vector<16x32xbf16>, vector<32x96xbf16>, vector<16x96xf32> -> vector<16x96xf32>
    %26 = vector.broadcast %7 : vector<1x96xf32> to vector<16x96xf32>
    %27 = arith.addf %25, %26 : vector<16x96xf32>
    %28 = vector.extract_strided_slice %27 {offsets = [0, 0], sizes = [16, 32], strides = [1, 1]} : vector<16x96xf32> to vector<16x32xf32>
    %29 = vector.shape_cast %28 : vector<16x32xf32> to vector<2x8x2x16xf32>
    %30 = tpu.transpose %29, [0, 2, 1, 3] : vector<2x8x2x16xf32> -> vector<2x2x8x16xf32>
    %31 = vector.shape_cast %30 : vector<2x2x8x16xf32> to vector<4x8x16xf32>
    %32 = arith.truncf %31 : vector<4x8x16xf32> to vector<4x8x16xbf16>
    %33 = vector.extract_strided_slice %27 {offsets = [0, 32], sizes = [16, 32], strides = [1, 1]} : vector<16x96xf32> to vector<16x32xf32>
    %34 = vector.shape_cast %33 : vector<16x32xf32> to vector<2x8x2x16xf32>
    %35 = tpu.transpose %34, [0, 2, 1, 3] : vector<2x8x2x16xf32> -> vector<2x2x8x16xf32>
    %36 = vector.shape_cast %35 : vector<2x2x8x16xf32> to vector<4x8x16xf32>
    %37 = arith.truncf %36 : vector<4x8x16xf32> to vector<4x8x16xbf16>
    %38 = vector.extract_strided_slice %27 {offsets = [0, 64], sizes = [16, 32], strides = [1, 1]} : vector<16x96xf32> to vector<16x32xf32>
    %39 = vector.shape_cast %38 : vector<16x32xf32> to vector<2x8x2x16xf32>
    %40 = tpu.transpose %39, [0, 2, 1, 3] : vector<2x8x2x16xf32> -> vector<2x2x8x16xf32>
    %41 = vector.shape_cast %40 : vector<2x2x8x16xf32> to vector<4x8x16xf32>
    %42 = arith.truncf %41 : vector<4x8x16xf32> to vector<4x8x16xbf16>
    "tpu.trace_start"() <{level = 10 : i32, message = "ntd,nsd->nts"}> : () -> ()
    %cst_25 = arith.constant dense<0.000000e+00> : vector<4x8x8xf32>
    %43 = tpu.matmul %32, %37, %cst_25 {dimension_numbers = #tpu.dot_dimension_numbers<[2], [2], [1], [1], [0, 0, 0, 1, 1, 1], [0], [0]>} : vector<4x8x16xbf16>, vector<4x8x16xbf16>, vector<4x8x8xf32> -> vector<4x8x8xf32>
    "tpu.trace_stop"() : () -> ()
    %44 = vector.shape_cast %43 : vector<4x8x8xf32> to vector<2x2x8x8xf32>
    %45 = vector.broadcast %5 : vector<2x1x1x8xf32> to vector<2x2x8x8xf32>
    %46 = arith.addf %44, %45 : vector<2x2x8x8xf32>
    %cst_26 = arith.constant dense<0xFF800000> : vector<2x2x8xf32>
    %47 = vector.multi_reduction <maximumf>, %46, %cst_26 [3] : vector<2x2x8x8xf32> to vector<2x2x8xf32>
    %48 = vector.shape_cast %47 : vector<2x2x8xf32> to vector<2x2x8x1xf32>
    %49 = vector.broadcast %48 : vector<2x2x8x1xf32> to vector<2x2x8x8xf32>
    %50 = arith.subf %46, %49 : vector<2x2x8x8xf32>
    %51 = math.exp %50 : vector<2x2x8x8xf32>
    %cst_27 = arith.constant dense<0.000000e+00> : vector<2x2x8xf32>
    %52 = vector.multi_reduction <add>, %51, %cst_27 [3] : vector<2x2x8x8xf32> to vector<2x2x8xf32>
    %53 = vector.shape_cast %52 : vector<2x2x8xf32> to vector<2x2x8x1xf32>
    %54 = tpu.reciprocal %53 {approx = true} : vector<2x2x8x1xf32> -> vector<2x2x8x1xf32>
    %55 = vector.broadcast %54 : vector<2x2x8x1xf32> to vector<2x2x8x8xf32>
    %56 = arith.mulf %51, %55 : vector<2x2x8x8xf32>
    %57 = vector.shape_cast %56 : vector<2x2x8x8xf32> to vector<4x8x8xf32>
    %58 = arith.truncf %57 : vector<4x8x8xf32> to vector<4x8x8xbf16>
    "tpu.trace_start"() <{level = 10 : i32, message = "nts,nsd->ntd"}> : () -> ()
    %cst_28 = arith.constant dense<0.000000e+00> : vector<4x8x16xf32>
    %59 = tpu.matmul %58, %42, %cst_28 {dimension_numbers = #tpu.dot_dimension_numbers<[2], [1], [1], [2], [0, 0, 0, 1, 1, 2], [0], [0]>} : vector<4x8x8xbf16>, vector<4x8x16xbf16>, vector<4x8x16xf32> -> vector<4x8x16xf32>
    "tpu.trace_stop"() : () -> ()
    %60 = vector.shape_cast %59 : vector<4x8x16xf32> to vector<2x2x8x16xf32>
    %61 = tpu.transpose %60, [0, 2, 1, 3] : vector<2x2x8x16xf32> -> vector<2x8x2x16xf32>
    %62 = vector.shape_cast %61 : vector<2x8x2x16xf32> to vector<16x32xf32>
    %63 = arith.truncf %62 : vector<16x32xf32> to vector<16x32xbf16>
    %c0_29 = arith.constant 0 : index
    %c0_30 = arith.constant 0 : index
    %c0_31 = arith.constant 0 : index
    %64 = vector.load %arg5[%c0_29, %c0_30, %c0_31] : memref<1x32x32xbf16, #tpu.memory_space<vmem>>, vector<1x32x32xbf16>
    %65 = vector.shape_cast %64 : vector<1x32x32xbf16> to vector<32x32xbf16>
    %cst_32 = arith.constant dense<0.000000e+00> : vector<16x32xf32>
    %66 = tpu.matmul %63, %65, %cst_32 {dimension_numbers = #tpu.dot_dimension_numbers<[1], [0], [0], [1], [0, 0, 1, 1], [], []>} : vector<16x32xbf16>, vector<32x32xbf16>, vector<16x32xf32> -> vector<16x32xf32>
    %67 = vector.broadcast %9 : vector<1x32xf32> to vector<16x32xf32>
    %68 = arith.addf %66, %67 : vector<16x32xf32>
    %69 = arith.addf %3, %68 : vector<16x32xf32>
    %cst_33 = arith.constant dense<0.000000e+00> : vector<16xf32>
    %70 = vector.multi_reduction <add>, %69, %cst_33 [1] : vector<16x32xf32> to vector<16xf32>
    %71 = vector.shape_cast %70 : vector<16xf32> to vector<16x1xf32>
    %cst_34 = arith.constant 3.200000e+01 : f32
    %72 = vector.broadcast %cst_34 : f32 to vector<16x1xf32>
    %73 = arith.divf %71, %72 : vector<16x1xf32>
    %74 = arith.mulf %69, %69 : vector<16x32xf32>
    %cst_35 = arith.constant dense<0.000000e+00> : vector<16xf32>
    %75 = vector.multi_reduction <add>, %74, %cst_35 [1] : vector<16x32xf32> to vector<16xf32>
    %76 = vector.shape_cast %75 : vector<16xf32> to vector<16x1xf32>
    %cst_36 = arith.constant 3.200000e+01 : f32
    %77 = vector.broadcast %cst_36 : f32 to vector<16x1xf32>
    %78 = arith.divf %76, %77 : vector<16x1xf32>
    %79 = arith.mulf %73, %73 : vector<16x1xf32>
    %80 = arith.subf %78, %79 : vector<16x1xf32>
    %81 = vector.broadcast %73 : vector<16x1xf32> to vector<16x32xf32>
    %82 = arith.subf %69, %81 : vector<16x32xf32>
    %cst_37 = arith.constant 9.99999996E-13 : f32
    %83 = vector.broadcast %cst_37 : f32 to vector<16x1xf32>
    %84 = arith.addf %80, %83 : vector<16x1xf32>
    %85 = math.rsqrt %84 : vector<16x1xf32>
    %86 = vector.broadcast %85 : vector<16x1xf32> to vector<16x32xf32>
    %87 = arith.mulf %82, %86 : vector<16x32xf32>
    %88 = vector.broadcast %11 : vector<1x32xf32> to vector<16x32xf32>
    %89 = arith.mulf %87, %88 : vector<16x32xf32>
    %90 = vector.broadcast %13 : vector<1x32xf32> to vector<16x32xf32>
    %91 = arith.addf %89, %90 : vector<16x32xf32>
    %92 = arith.truncf %91 : vector<16x32xf32> to vector<16x32xbf16>
    %c0_38 = arith.constant 0 : index
    %c0_39 = arith.constant 0 : index
    %c0_40 = arith.constant 0 : index
    %93 = vector.load %arg6[%c0_38, %c0_39, %c0_40] : memref<1x32x64xbf16, #tpu.memory_space<vmem>>, vector<1x32x64xbf16>
    %94 = vector.shape_cast %93 : vector<1x32x64xbf16> to vector<32x64xbf16>
    %cst_41 = arith.constant dense<0.000000e+00> : vector<16x64xf32>
    %95 = tpu.matmul %92, %94, %cst_41 {dimension_numbers = #tpu.dot_dimension_numbers<[1], [0], [0], [1], [0, 0, 1, 1], [], []>} : vector<16x32xbf16>, vector<32x64xbf16>, vector<16x64xf32> -> vector<16x64xf32>
    %96 = vector.broadcast %15 : vector<1x64xf32> to vector<16x64xf32>
    %97 = arith.addf %95, %96 : vector<16x64xf32>
    %cst_42 = arith.constant 0.000000e+00 : f32
    %98 = vector.broadcast %cst_42 : f32 to vector<16x64xf32>
    %99 = arith.maximumf %97, %98 : vector<16x64xf32>
    %100 = arith.truncf %99 : vector<16x64xf32> to vector<16x64xbf16>
    %c0_43 = arith.constant 0 : index
    %c0_44 = arith.constant 0 : index
    %c0_45 = arith.constant 0 : index
    %101 = vector.load %arg7[%c0_43, %c0_44, %c0_45] : memref<1x64x32xbf16, #tpu.memory_space<vmem>>, vector<1x64x32xbf16>
    %102 = vector.shape_cast %101 : vector<1x64x32xbf16> to vector<64x32xbf16>
    %cst_46 = arith.constant dense<0.000000e+00> : vector<16x32xf32>
    %103 = tpu.matmul %100, %102, %cst_46 {dimension_numbers = #tpu.dot_dimension_numbers<[1], [0], [0], [1], [0, 0, 1, 1], [], []>} : vector<16x64xbf16>, vector<64x32xbf16>, vector<16x32xf32> -> vector<16x32xf32>
    %104 = vector.broadcast %17 : vector<1x32xf32> to vector<16x32xf32>
    %105 = arith.addf %103, %104 : vector<16x32xf32>
    %106 = arith.addf %91, %105 : vector<16x32xf32>
    %cst_47 = arith.constant dense<0.000000e+00> : vector<16xf32>
    %107 = vector.multi_reduction <add>, %106, %cst_47 [1] : vector<16x32xf32> to vector<16xf32>
    %108 = vector.shape_cast %107 : vector<16xf32> to vector<16x1xf32>
    %cst_48 = arith.constant 3.200000e+01 : f32
    %109 = vector.broadcast %cst_48 : f32 to vector<16x1xf32>
    %110 = arith.divf %108, %109 : vector<16x1xf32>
    %111 = arith.mulf %106, %106 : vector<16x32xf32>
    %cst_49 = arith.constant dense<0.000000e+00> : vector<16xf32>
    %112 = vector.multi_reduction <add>, %111, %cst_49 [1] : vector<16x32xf32> to vector<16xf32>
    %113 = vector.shape_cast %112 : vector<16xf32> to vector<16x1xf32>
    %cst_50 = arith.constant 3.200000e+01 : f32
    %114 = vector.broadcast %cst_50 : f32 to vector<16x1xf32>
    %115 = arith.divf %113, %114 : vector<16x1xf32>
    %116 = arith.mulf %110, %110 : vector<16x1xf32>
    %117 = arith.subf %115, %116 : vector<16x1xf32>
    %118 = vector.broadcast %110 : vector<16x1xf32> to vector<16x32xf32>
    %119 = arith.subf %106, %118 : vector<16x32xf32>
    %cst_51 = arith.constant 9.99999996E-13 : f32
    %120 = vector.broadcast %cst_51 : f32 to vector<16x1xf32>
    %121 = arith.addf %117, %120 : vector<16x1xf32>
    %122 = math.rsqrt %121 : vector<16x1xf32>
    %123 = vector.broadcast %122 : vector<16x1xf32> to vector<16x32xf32>
    %124 = arith.mulf %119, %123 : vector<16x32xf32>
    %125 = vector.broadcast %19 : vector<1x32xf32> to vector<16x32xf32>
    %126 = arith.mulf %124, %125 : vector<16x32xf32>
    %127 = vector.broadcast %21 : vector<1x32xf32> to vector<16x32xf32>
    %128 = arith.addf %126, %127 : vector<16x32xf32>
    %c0_52 = arith.constant 0 : index
    %c0_53 = arith.constant 0 : index
    %129 = vector.load %arg10[%c0_52, %c0_53] : memref<16x32xf32, #tpu.memory_space<vmem>>, vector<16x32xf32>
    tpu.vector_store %arg10[%c0_52, %c0_53], %128 {strides = array<i32>} : memref<16x32xf32, #tpu.memory_space<vmem>>, vector<16x32xf32>,
    %c1_i32 = arith.constant 1 : i32
    %130 = arith.cmpi eq, %arg1, %c1_i32 : i32
    %131 = arith.extui %130 : i1 to i32
    %c0_i32_54 = arith.constant 0 : i32
    %132 = arith.cmpi ne, %131, %c0_i32_54 : i32
    scf.if %132 {
      %133 = vector.shape_cast %128 : vector<16x32xf32> to vector<2x8x32xf32>
      %134 = vector.extract_strided_slice %133 {offsets = [0, 0, 0], sizes = [2, 1, 32], strides = [1, 1, 1]} : vector<2x8x32xf32> to vector<2x1x32xf32>
      %c0_55 = arith.constant 0 : index
      %c0_56 = arith.constant 0 : index
      %c0_57 = arith.constant 0 : index
      %135 = vector.load %arg9[%c0_55, %c0_56, %c0_57] : memref<2x1x32xf32, #tpu.memory_space<vmem>>, vector<2x1x32xf32>
      tpu.vector_store %arg9[%c0_55, %c0_56, %c0_57], %134 {strides = array<i32>} : memref<2x1x32xf32, #tpu.memory_space<vmem>>, vector<2x1x32xf32>,
    } else {
    }
    return
  }
  func.func @transform_0(%arg0: i32, %arg1: i32) -> (i32, i32, i32) {
    %c0_i32 = arith.constant 0 : i32
    %c0_i32_0 = arith.constant 0 : i32
    %c0_i32_1 = arith.constant 0 : i32
    return %arg0, %c0_i32, %c0_i32_0 : i32, i32, i32
  }
  func.func @transform_1(%arg0: i32, %arg1: i32) -> (i32, i32, i32) {
    %c0_i32 = arith.constant 0 : i32
    %c0_i32_0 = arith.constant 0 : i32
    %c0_i32_1 = arith.constant 0 : i32
    return %arg0, %c0_i32, %c0_i32_0 : i32, i32, i32
  }
  func.func @transform_2(%arg0: i32, %arg1: i32) -> (i32, i32, i32) {
    %c0_i32 = arith.constant 0 : i32
    %c0_i32_0 = arith.constant 0 : i32
    %c0_i32_1 = arith.constant 0 : i32
    return %arg1, %c0_i32, %c0_i32_0 : i32, i32, i32
  }
  func.func @transform_3(%arg0: i32, %arg1: i32) -> (i32, i32, i32) {
    %c0_i32 = arith.constant 0 : i32
    %c0_i32_0 = arith.constant 0 : i32
    %c0_i32_1 = arith.constant 0 : i32
    return %arg1, %c0_i32, %c0_i32_0 : i32, i32, i32
  }
  func.func @transform_4(%arg0: i32, %arg1: i32) -> (i32, i32, i32) {
    %c0_i32 = arith.constant 0 : i32
    %c0_i32_0 = arith.constant 0 : i32
    %c0_i32_1 = arith.constant 0 : i32
    return %arg1, %c0_i32, %c0_i32_0 : i32, i32, i32
  }
  func.func @transform_5(%arg0: i32, %arg1: i32) -> (i32, i32, i32) {
    %c0_i32 = arith.constant 0 : i32
    %c0_i32_0 = arith.constant 0 : i32
    %c0_i32_1 = arith.constant 0 : i32
    return %arg1, %c0_i32, %c0_i32_0 : i32, i32, i32
  }
  func.func @transform_6(%arg0: i32, %arg1: i32) -> (i32, i32, i32) {
    %c0_i32 = arith.constant 0 : i32
    %c0_i32_0 = arith.constant 0 : i32
    %c0_i32_1 = arith.constant 0 : i32
    return %arg1, %c0_i32, %c0_i32_0 : i32, i32, i32
  }
  func.func @transform_7(%arg0: i32, %arg1: i32) -> (i32, i32, i32) {
    %c0_i32 = arith.constant 0 : i32
    %c0_i32_0 = arith.constant 0 : i32
    %c0_i32_1 = arith.constant 0 : i32
    return %arg0, %c0_i32, %c0_i32_0 : i32, i32, i32
  }
}

</mosaic_0001>

<bundles_post_ra>
// kernel: tpu_custom_call.1
= control target key start
LH: loop header
LB: loop body
LE: loop exit
PB: predicated region body
PF: predicated region fallthrough
CT: control target
= control target key end

     0   :  { %12 = vsyncpa [#allocation4], 0  ;;  %s3192_s0 = inlined_call_operand.hbm [shape: f32[2,8,32], index: 0, kind: input, shape index: {}]   ;;  %s3193_s1 = inlined_call_operand.vmem [shape: f32[2,1,8], index: 1, kind: input, shape index: {}]   ;;  %s3194_s2 = inlined_call_operand.vmem [shape: bf16[2,32,96], index: 2, kind: input, shape index: {}]   ;;  %s3195_s3 = inlined_call_operand.vmem [shape: bf16[2,32,32], index: 3, kind: input, shape index: {}]   ;;  %s3196_s4 = inlined_call_operand.vmem [shape: bf16[2,32,64], index: 4, kind: input, shape index: {}]   ;;  %s3197_s5 = inlined_call_operand.vmem [shape: bf16[2,64,32], index: 5, kind: input, shape index: {}]   ;;  %s3198_s6 = inlined_call_operand.vmem [shape: f32[2,8,96], index: 6, kind: input, shape index: {}]   ;;  %s3199_s7 = inlined_call_operand.hbm [shape: f32[2,1,32], index: 7, kind: output, shape index: {}]  }
   0x1   :  { %13 = vsyncpa [#allocation5], 0  ;;  %s2775_s24 = smov 0   ;;  %s2777_s25 = smov 0  }
   0x2   :  { %s2779_s26 = smov 0  }
   0x3 LB: > { %s2356_s27 = sadd.s32 4294967295, %s2720_s26   ;;  %s28_s28 = sadd.s32 1, %s2716_s25  ;;  %s2720_s26 = sphi %s2779_s26, %s19_s26   ;;  %s2716_s25 = sphi %s2777_s25, %s3210_s25   ;;  %s2712_s24 = sphi %s2775_s24, %s3209_s24  }
   0x4   : > { %p29_p0 = scmp.ge.s32.totalorder %s28_s28, 2  ;;  %p2357_p1 = scmp.ge.s32.totalorder %s2720_s26, 1 }
   0x5   : > { %p244_p2 = scmp.lt.s32.totalorder %s2720_s26, 3  ;;  %p2802_p4 = scmp.eq.s32.totalorder %s2356_s27, 0 }
   0x6   : > { %s3212_s28 = smov (%p29_p0, %s28_s28), 0  ;;  %s2722_s8 = smov [#allocation3]  }
   0x7   : > { %p2796_p3 = pnand %p2357_p1, %p244_p2  ;;  %s259_s9 = sshll.u32 %s2722_s8, 4  ;;  %s260_s9 = int_to_ptr.vmem [resolvable:$true] %s259_s9 }
   0x8   : > { %s3204_s30 = scalar_select %p2802_p4, 1, 0 }
   0x9   : > { %s3203_s29 = scalar_select %p2796_p3, 1, 0 }
   0xa   : > { %p2552_p5 = pneg %p2796_p3  ;;  %s2636_s13 = scalar_lea.hbm %s3192_s0, 256 }
   0xb   : > { %p2637_p7 = scmp.ne.s32.totalorder %s3192_s0, %s2636_s13  ;;  %p2643_p11 = scmp.lt.u32.totalorder %s2636_s13, %s3192_s0 }
   0xc   : > { %p2810_p6 = pnand %p2802_p4, %p2552_p5 }
   0xe   : > { %p2638_p8 = pneg %p2810_p6 }
  0x10   : > { %p2639_p9 = pnand %p2638_p8, %p2637_p7 }
  0x12   : > { %p2640_p10 = pneg %p2639_p9 }
  0x14   : > { %p2645_p12 = pnand %p2643_p11, %p2640_p10 }
  0x16   : > { %2648 = shalt.err (!%p2645_p12)
}
  0x17   : > { %s2649_s18 = scalar_lea.vmem %s260_s9, 256  ;;  %p2657_p2 = scmp.lt.s32.totalorder %s260_s9, %s260_s9 }
  0x18   : > { %p2650_p13 = scmp.ne.s32.totalorder %s260_s9, %s2649_s18  ;;  %p2658_p5 = scmp.lt.s32.totalorder %s2649_s18, %s2649_s18 }
  0x1a   : > { %p2652_p0 = pnand %p2650_p13, %p2638_p8  ;;  %p2659_p4 = por %p2658_p5, %p2657_p2 }
  0x1c   : > { %p2653_p1 = pneg %p2652_p0 }
  0x1e   : > { %p2660_p3 = pnand %p2659_p4, %p2653_p1 }
  0x20   : > { %2663 = shalt.err (!%p2660_p3)
}
  0x21   : > { %s2723_s19 = smov 128   ;;  %s2724_s20 = smov 8  }
  0x22   : > { %2555 = dma.hbm_to_vmem [thread:$0]  (!%p2810_p6), %s3192_s0, 256, %s260_s9, [#allocation4], %s2723_s19, %s2723_s19, %s2724_s20  }
  0x23   : > { %p3206_p7 = scmp.ne.s32.totalorder %s3203_s29, 0 }
  0x24   : > { %p3207_p9 = scmp.ne.s32.totalorder (!%p3206_p7), %s3204_s30, 0 }
  0x25   : > { %322 = sbr.rel (%p3206_p7) target bundleno = 2470 (0x9a6), region = 48 }
  0x2c   : > { %2703 = dma.done.wait (%p3207_p9), [#allocation4], 256  }
  0x2d   : > { %2705 = vsyncadd (%p3207_p9), [#allocation4], 4294967040  ;;  %p378_p3 = scmp.lt.s32.totalorder %s2712_s24, 1  ;;  %p2372_p4 = scmp.ne.s32.totalorder %s2712_s24, 0 }
  0x2e   : > { %v408_v0 = vld [vmem:[#allocation3] sm:$0xff] (!%p2372_p4)  ;;  %vm410_vm0 = vcmask (!%p2372_p4), 261120   ;;  %v409_v1 = vld [vmem:[#allocation3 + $0x8] sm:$0xff] (!%p2372_p4) }
  0x2f   : > { %s379_s23 = scalar_select %p378_p3, %s2712_s24, 1 }
  0x30   : > { %407 = sbr.rel (%p2372_p4) target bundleno = 55 (0x37), region = 56  ;;  %411 = vst.msk [vmem:[#allocation2] sm:$0xff] (!%p2372_p4), %vm410_vm0, %v408_v0  ;;  %412 = vst.msk [vmem:[#allocation2 + $0x8] sm:$0xff] (!%p2372_p4), %vm410_vm0, %v409_v1 }
  0x31   : > { %s2426_s8 = sshll.u32 %s379_s23, 4  ;;  %s2429_s11 = sshll.u32 %s379_s23, 5 }
  0x32   : > { %s382_s13 = scalar_lea.vmem %s3194_s2, %s2426_s8  ;;  %s2844_s29 = scalar_lea.vmem %s3195_s3, %s2426_s8 }
  0x33   : > { %s2849_s30 = scalar_lea.vmem %s3196_s4, %s2426_s8  ;;  %s2854_s19 = scalar_lea.vmem %s3197_s5, %s2429_s11 }
  0x34   : > { %s2371_s20 = sshll.u32 %s379_s23, 3 }
  0x35   : > { %s2859_s10 = scalar_lea.vmem %s3198_s6, %s2371_s20 }
  0x37 PF: > { %v2602_v2 = vld [vmem:[%s382_s13] sm:$0xff]   ;;  %v2725_v3 = vmov 0.0   ;;  %v2603_v4 = vld [vmem:[%s382_s13 + $0x8] sm:$0xff]   ;;  %vm2726_vm1 = vmmov 0   ;;  %vm446_vm2 = vcmask 261120   ;;  %s2727_s23 = smov 96   ;;  %v503_v19 = vlaneseq }
  0x38   : > { %2460 = vmatprep.subr.bf16.mxu0 %v2725_v3  ;;  %2468 = vmatprep.subr.bf16.mxu1 %v2725_v3  ;;  %v2866_v5 = vld [vmem:[#allocation2] sm:$0xff]  ;;  %v2868_v6 = vld [vmem:[#allocation2 + $0x8] sm:$0xff]  ;;  %s2728_s8 = smov 112   ;;  %v2729_v17 = vmov 1983009808   ;;  %vm1231_vm3 = vcmask 130048  }
  0x39   : > { %2461 = vmatpush3.bf16.msra.mxu0 %v2602_v2  ;;  %2464 = vmatprep.mubr.msk.bf16.mxu0 %vm2726_vm1, %v2725_v3  ;;  %v425_v7 = vpack.c.bf16 %v2868_v6, %v2866_v5  ;;  %v2373_v8 = vld [vmem:[%s2859_s10] ss:$0 sm:$0xff]  ;;  %v501_v18 = vunpack.c.l.s4 %v2729_v17  ;;  %v504_v21 = vshrl.u32 %v503_v19, 7  ;;  %v2730_v23 = vmov 1934713408   ;;  %s2731_s14 = smov 64  }
  0x3a   : > { %2462 = vmatprep.subr.bf16.mxu0 %v2725_v3  ;;  %2470 = vmatprep.mubr.msk.bf16.mxu1 %vm2726_vm1, %v2725_v3  ;;  %v532_v24 = vunpack.c.l.s4 %v2730_v23  ;;  %vm1432_vm4 = vcmask 64512   ;;  %vm1484_vm5 = vcmask 1043456   ;;  %s2732_s15 = smov 16   ;;  %vm2122_vm6 = vcmask 523264   ;;  %p2421_p6 = scmp.ne.s32.totalorder %s2712_s24, 1 }
  0x3b   : > { %v502_v20 = vunpack.c.0.s8 %v501_v18  ;;  %vm2217_vm7 = vcmask (!%p2421_p6), 253952  }
  0x3c   : > { %v533_v28 = vunpack.c.0.s8 %v532_v24 }
  0x3d   : > { %2463 = vmatpush3.bf16.msra.mxu0 %v2603_v4  ;;  %v2898_v26 = vsub.s32 %v502_v20, %v504_v21 }
  0x3e   : > { %2474 = vmatprep.subr.bf16.mxu0 %v2725_v3  ;;  %v2906_v34 = vsub.s32 %v533_v28, %v504_v21 }
  0x40   : > { %2465 = vmatmul.mubr.msk.bf16.vlgmr.msra.gmra.mrb[0].mxu0 %vm446_vm2, %v425_v7 }
  0x41   : > { %2476 = vmatprep.mubr.msk.bf16.mxu0 %vm2726_vm1, %v2725_v3 }
 0x113   : > { %v484_v9 = vpop.f32.mrb[0].mxu0 }
 0x114   : > { %v2880_v10 = vadd.f32 %v2373_v8, %v484_v9  ;;  %v2466_v11 = vpop.f32.mrb[1].mxu0 }
 0x115   : > { %v487_v12 = vpop.f32.mrb[2].mxu0 }
 0x116   : > { %735 = vrot.lane.b32.xlu1 %v2880_v10, %s2727_s23  ;;  %493 = vrot.lane.b32.xlu0 %v2880_v10, %s2728_s8  ;;  %v2467_v13 = vpop.f32.mrb[3].mxu0  ;;  %v2884_v14 = vadd.f32 %v2373_v8, %v487_v12  ;;  %v499_v25 = vcombine.high %v2880_v10, %v2725_v3  ;;  %v506_v31 = vrot.slane %v2880_v10, %v2898_v26 }
 0x118   : > { %v513_v30 = vrot.slane %v499_v25, %v2898_v26  ;;  %v565_v40 = vcombine.high %v2884_v14, %v2725_v3  ;;  %v572_v43 = vrot.slane %v2884_v14, %v2898_v26 }
 0x11a   : > { %495 = vrot.lane.b32.xlu0 %v2884_v14, %s2728_s8  ;;  %v579_v52 = vrot.slane %v565_v40, %v2898_v26 }
 0x11e   : > { %737 = vrot.lane.b32.xlu0 %v2884_v14, %s2727_s23 }
 0x188   : > { %v2888_v15 = vpop.permute.xlu0 %493  ;;  %v736_v37 = vpop.permute.xlu1 %735 }
 0x189   : > { %739 = vrot.lane.b32.xlu1 %v2888_v15, %s2727_s23  ;;  %v514_v22 = vcombine.high %v2888_v15, %v2725_v3  ;;  %v521_v29 = vrot.slane %v2888_v15, %v2898_v26  ;;  %v747_v44 = vcombine.high %v736_v37, %v2725_v3  ;;  %v754_v50 = vrot.slane %v736_v37, %v2898_v26 }
 0x18b   : > { %v528_v27 = vrot.slane %v514_v22, %v2898_v26  ;;  %v529_v35 = vcombine.low %v506_v31, %v521_v29  ;;  %v530_v36 = vcombine.high %v506_v31, %v521_v29  ;;  %v761_v54 = vrot.slane %v747_v44, %v2898_v26 }
 0x18c   : > { %v2891_v16 = vpop.permute.xlu0 %495 }
 0x18d   : > { %741 = vrot.lane.b32.xlu1 %v2891_v16, %s2727_s23  ;;  %v545_v32 = vcombine.low %v513_v30, %v528_v27  ;;  %v546_v33 = vcombine.high %v513_v30, %v528_v27  ;;  %v580_v38 = vcombine.high %v2891_v16, %v2725_v3  ;;  %v587_v39 = vrot.slane %v2891_v16, %v2898_v26 }
 0x18e   : > { %v537_v45 = vrot.slane %v529_v35, %v2906_v34  ;;  %v544_v46 = vrot.slane %v530_v36, %v2906_v34 }
 0x18f   : > { %v553_v41 = vrot.slane %v545_v32, %v2906_v34  ;;  %v560_v42 = vrot.slane %v546_v33, %v2906_v34  ;;  %v594_v47 = vrot.slane %v580_v38, %v2898_v26  ;;  %v595_v48 = vcombine.low %v572_v43, %v587_v39 }
 0x190   : > { %v596_v49 = vcombine.high %v572_v43, %v587_v39  ;;  %v631_v55 = vcombine.low %v537_v45, %v544_v46  ;;  %v738_v56 = vpop.permute.xlu0 %737  ;;  %v2377_v59 = vcombine.high %v537_v45, %v544_v46 }
 0x191   : > { %v647_v51 = vcombine.low %v553_v41, %v560_v42  ;;  %v2378_v60 = vcombine.high %v553_v41, %v560_v42  ;;  %v2928_v61 = vrot.slane %v595_v48, %v2906_v34  ;;  %v611_v62 = vcombine.low %v579_v52, %v594_v47 }
 0x192   : > { %v2931_v63 = vrot.slane %v596_v49, %v2906_v34  ;;  %v612_v4 = vcombine.high %v579_v52, %v594_v47  ;;  %v813_v7 = vcombine.high %v738_v56, %v2725_v3  ;;  %v820_v8 = vrot.slane %v738_v56, %v2898_v26 }
 0x193   : > { %v654_v11 = vrot.slane %v647_v51, %v2898_v26  ;;  %v619_v19 = vrot.slane %v611_v62, %v2906_v34  ;;  %v662_v22 = vrot.slane %v2378_v60, %v2898_v26  ;;  %v638_v49 = vrot.slane %v631_v55, %v2898_v26 }
 0x194   : > { %v827_v28 = vrot.slane %v813_v7, %v2898_v26  ;;  %v626_v41 = vrot.slane %v612_v4, %v2906_v34  ;;  %v2379_v4 = vcombine.high %v2928_v61, %v2931_v63 }
 0x195   : > { %v671_v52 = vcombine.low %v654_v11, %v662_v22 }
 0x196   : > { %v2380_v60 = vcombine.high %v619_v19, %v626_v41 }
 0x197   : > { %v678_v11 = vrot.slane %v671_v52, %v2906_v34 }
 0x1fb   : > { %v740_v53 = vpop.permute.xlu1 %739 }
 0x1fc   : > { %v762_v57 = vcombine.high %v740_v53, %v2725_v3  ;;  %v769_v58 = vrot.slane %v740_v53, %v2898_v26 }
 0x1fe   : > { %v776_v0 = vrot.slane %v762_v57, %v2898_v26  ;;  %v777_v1 = vcombine.low %v754_v50, %v769_v58  ;;  %v778_v2 = vcombine.high %v754_v50, %v769_v58  ;;  %v646_v50 = vrot.slane %v2377_v59, %v2898_v26 }
 0x1ff   : > { %v742_v9 = vpop.permute.xlu1 %741  ;;  %v697_v58 = vcombine.low %v619_v19, %v626_v41 }
 0x200   : > { %v785_v12 = vrot.slane %v777_v1, %v2906_v34  ;;  %v792_v13 = vrot.slane %v778_v2, %v2906_v34  ;;  %v793_v17 = vcombine.low %v761_v54, %v776_v0  ;;  %v794_v18 = vcombine.high %v761_v54, %v776_v0 }
 0x201   : > { %v828_v20 = vcombine.high %v742_v9, %v2725_v3  ;;  %v835_v21 = vrot.slane %v742_v9, %v2898_v26  ;;  %v681_v1 = vcombine.low %v2928_v61, %v2931_v63  ;;  %v663_v9 = vcombine.low %v638_v49, %v646_v50 }
 0x202   : > { %v801_v23 = vrot.slane %v793_v17, %v2906_v34  ;;  %v808_v24 = vrot.slane %v794_v18, %v2906_v34  ;;  %v879_v25 = vcombine.low %v785_v12, %v792_v13  ;;  %v2381_v27 = vcombine.high %v785_v12, %v792_v13 }
 0x203   : > { %v842_v29 = vrot.slane %v828_v20, %v2898_v26  ;;  %v843_v30 = vcombine.low %v820_v8, %v835_v21  ;;  %v844_v31 = vcombine.high %v820_v8, %v835_v21  ;;  %v704_v13 = vrot.slane %v697_v58, %v2898_v26 }
 0x204   : > { %v895_v32 = vcombine.low %v801_v23, %v808_v24  ;;  %v2382_v33 = vcombine.high %v801_v23, %v808_v24  ;;  %v886_v35 = vrot.slane %v879_v25, %v2898_v26  ;;  %v894_v36 = vrot.slane %v2381_v27, %v2898_v26 }
 0x205   : > { %v851_v37 = vrot.slane %v843_v30, %v2906_v34  ;;  %v858_v38 = vrot.slane %v844_v31, %v2906_v34  ;;  %v859_v39 = vcombine.low %v827_v28, %v842_v29  ;;  %v860_v40 = vcombine.high %v827_v28, %v842_v29 }
 0x206   : > { %v902_v42 = vrot.slane %v895_v32, %v2898_v26  ;;  %v910_v43 = vrot.slane %v2382_v33, %v2898_v26  ;;  %v911_v44 = vcombine.low %v886_v35, %v894_v36  ;;  %v712_v17 = vrot.slane %v2380_v60, %v2898_v26  ;;  %v2394_v60 = vld [vmem:[%s3193_s1 + $0x1] ss:$0 sm:$0xff] }
 0x207   : > { %v867_v45 = vrot.slane %v859_v39, %v2906_v34  ;;  %v874_v46 = vrot.slane %v860_v40, %v2906_v34  ;;  %v929_v47 = vcombine.low %v851_v37, %v858_v38  ;;  %v2383_v48 = vcombine.high %v851_v37, %v858_v38 }
 0x208   : > { %v919_v51 = vcombine.low %v902_v42, %v910_v43  ;;  %v918_v62 = vrot.slane %v911_v44, %v2906_v34  ;;  %v688_v20 = vrot.slane %v681_v1, %v2898_v26  ;;  %v696_v61 = vrot.slane %v2379_v4, %v2898_v26 }
 0x209   : > { %v936_v53 = vrot.slane %v929_v47, %v2898_v26  ;;  %v944_v54 = vrot.slane %v2383_v48, %v2898_v26  ;;  %v945_v56 = vcombine.low %v867_v45, %v874_v46  ;;  %v2384_v57 = vcombine.high %v867_v45, %v874_v46  ;;  %v2393_v45 = vld [vmem:[%s3193_s1] ss:$0 sm:$0xff] }
 0x20a   : > { %v926_v0 = vrot.slane %v919_v51, %v2906_v34  ;;  %v670_v24 = vrot.slane %v663_v9, %v2906_v34  ;;  %v721_v30 = vcombine.low %v704_v13, %v712_v17  ;;  %v713_v31 = vcombine.low %v688_v20, %v696_v61 }
 0x20b   : > { %v952_v55 = vrot.slane %v945_v56, %v2898_v26  ;;  %v960_v59 = vrot.slane %v2384_v57, %v2898_v26  ;;  %v961_v2 = vcombine.low %v936_v53, %v944_v54 }
 0x20c   : > { %v927_v7 = vcombine.low %v918_v62, %v926_v0  ;;  %v928_v8 = vcombine.high %v918_v62, %v926_v0  ;;  %v679_v28 = vcombine.low %v670_v24, %v678_v11  ;;  %v680_v29 = vcombine.high %v670_v24, %v678_v11 }
 0x20d   : > { %v969_v12 = vcombine.low %v952_v55, %v960_v59  ;;  %v968_v21 = vrot.slane %v961_v2, %v2906_v34  ;;  %v728_v37 = vrot.slane %v721_v30, %v2906_v34  ;;  %v720_v40 = vrot.slane %v713_v31, %v2906_v34 }
 0x20e   : > { %v979_v18 = vpack.c.bf16 %v927_v7, %v927_v7  ;;  %v980_v19 = vpack.c.bf16 %v928_v8, %v928_v8  ;;  %v731_v35 = vpack.c.bf16 %v679_v28, %v679_v28  ;;  %v732_v36 = vpack.c.bf16 %v680_v29, %v680_v29 }
 0x20f   : > { %v976_v22 = vrot.slane %v969_v12, %v2906_v34  ;;  %v729_v41 = vcombine.low %v720_v40, %v728_v37  ;;  %v730_v42 = vcombine.high %v720_v40, %v728_v37 }
 0x210   : > { %v1236_v63 = vsel %vm1231_vm3, %v979_v18, 0  ;;  %v1282_v23 = vsel %vm1231_vm3, %v980_v19, 0 }
 0x211   : > { %2469 = vmatpush3.bf16.xpose.msra.mxu1 %v1236_v63  ;;  %2475 = vmatpush3.bf16.xpose.msra.mxu0 %v1282_v23  ;;  %v977_v25 = vcombine.low %v968_v21, %v976_v22  ;;  %v978_v27 = vcombine.high %v968_v21, %v976_v22  ;;  %v733_v43 = vpack.c.bf16 %v729_v41, %v729_v41 }
 0x212   : > { %2480 = vmatprep.subr.bf16.mxu1 %v2725_v3  ;;  %2486 = vmatprep.subr.bf16.mxu0 %v2725_v3  ;;  %v734_v44 = vpack.c.bf16 %v730_v42, %v730_v42 }
 0x213   : > { %v981_v32 = vpack.c.bf16 %v977_v25, %v977_v25  ;;  %v982_v33 = vpack.c.bf16 %v978_v27, %v978_v27 }
 0x215   : > { %v1328_v38 = vsel %vm1231_vm3, %v981_v32, 0  ;;  %v1374_v39 = vsel %vm1231_vm3, %v982_v33, 0 }
 0x218   : > { %2471 = vmatmul.mubr.msk.bf16.vlgmr.msra.gmra.mrb[0].mxu1 %vm1231_vm3, %v731_v35  ;;  %2477 = vmatmul.mubr.msk.bf16.vlgmr.msra.gmra.mrb[4].mxu0 %vm1231_vm3, %v732_v36 }
 0x219   : > { %2481 = vmatpush3.bf16.xpose.msra.mxu1 %v1328_v38  ;;  %2487 = vmatpush3.bf16.xpose.msra.mxu0 %v1374_v39 }
 0x21a   : > { %2482 = vmatprep.mubr.msk.bf16.mxu1 %vm2726_vm1, %v2725_v3  ;;  %2488 = vmatprep.mubr.msk.bf16.mxu0 %vm2726_vm1, %v2725_v3 }
 0x21b   : > { %2492 = vmatprep.subr.bf16.mxu1 %v2725_v3  ;;  %2498 = vmatprep.subr.bf16.mxu0 %v2725_v3 }
 0x220   : > { %2483 = vmatmul.mubr.msk.bf16.vlgmr.msra.gmra.mrb[4].mxu1 %vm1231_vm3, %v733_v43  ;;  %2489 = vmatmul.mubr.msk.bf16.vlgmr.msra.gmra.mrb[8].mxu0 %vm1231_vm3, %v734_v44 }
 0x221   : > { %2494 = vmatprep.mubr.msk.bf16.mxu1 %vm2726_vm1, %v2725_v3  ;;  %2500 = vmatprep.mubr.msk.bf16.mxu0 %vm2726_vm1, %v2725_v3 }
 0x2eb   : > { %v1272_v46 = vpop.f32.mrb[0].mxu1  ;;  %v1318_v47 = vpop.f32.mrb[4].mxu0 }
 0x2ec   : > { %v1428_v48 = vadd.f32 %v2393_v45, %v1272_v46  ;;  %v1429_v49 = vadd.f32 %v2393_v45, %v1318_v47  ;;  %v2472_v50 = vpop.f32.mrb[1].mxu1  ;;  %v2478_v51 = vpop.f32.mrb[5].mxu0 }
 0x2ed   : > { %v1275_v52 = vpop.f32.mrb[2].mxu1  ;;  %v1321_v53 = vpop.f32.mrb[6].mxu0 }
 0x2ee   : > { %v2473_v54 = vpop.f32.mrb[3].mxu1  ;;  %v2479_v56 = vpop.f32.mrb[7].mxu0  ;;  %v1433_v57 = vsel %vm1432_vm4, %v1428_v48, -inf  ;;  %v1436_v58 = vsel %vm1432_vm4, %v1429_v49, -inf }
 0x2ef   : > { %1434 = vmax.xlane.f32.xlu0 %v1433_v57  ;;  %1437 = vmax.xlane.f32.xlu1 %v1436_v58 }
 0x2f3   : > { %v1364_v62 = vpop.f32.mrb[4].mxu1  ;;  %v1410_v0 = vpop.f32.mrb[8].mxu0 }
 0x2f4   : > { %v1430_v1 = vadd.f32 %v2394_v60, %v1364_v62  ;;  %v2484_v55 = vpop.f32.mrb[5].mxu1  ;;  %v2490_v59 = vpop.f32.mrb[9].mxu0  ;;  %v1431_v7 = vadd.f32 %v2394_v60, %v1410_v0 }
 0x2f5   : > { %v1367_v2 = vpop.f32.mrb[6].mxu1  ;;  %v1413_v4 = vpop.f32.mrb[10].mxu0 }
 0x2f6   : > { %v2485_v8 = vpop.f32.mrb[7].mxu1  ;;  %v2491_v9 = vpop.f32.mrb[11].mxu0  ;;  %v1439_v11 = vsel %vm1432_vm4, %v1430_v1, -inf  ;;  %v1442_v12 = vsel %vm1432_vm4, %v1431_v7, -inf }
 0x2f7   : > { %1440 = vmax.xlane.f32.xlu0 %v1439_v11 }
 0x2fb   : > { %1443 = vmax.xlane.f32.xlu0 %v1442_v12 }
 0x300   : > { %983 = vrot.lane.b32.xlu1 %v2880_v10, %s2731_s14 }
 0x311   : > { %987 = vrot.lane.b32.xlu0 %v2888_v15, %s2731_s14 }
 0x37c   : > { %v1435_v13 = vpop.xlane.xlu0 %1434  ;;  %v1438_v17 = vpop.xlane.xlu1 %1437 }
 0x37d   : > { %v1445_v18 = vsub.f32 %v1428_v48, %v1435_v13  ;;  %v1446_v19 = vsub.f32 %v1429_v49, %v1438_v17 }
 0x37f   : > { %v1449_v20 = vmul.f32 1.442695, %v1445_v18  ;;  %v1451_v21 = vmul.f32 1.442695, %v1446_v19 }
 0x380   : > { %v984_v23 = vpop.permute.xlu1 %983 }
 0x381   : > { %2612 = vpow2.f32 %v1449_v20  ;;  %v995_v10 = vcombine.high %v984_v23, %v2725_v3  ;;  %v1002_v29 = vrot.slane %v984_v23, %v2898_v26 }
 0x382   : > { %2614 = vpow2.f32 %v1451_v21 }
 0x383   : > { %v1009_v36 = vrot.slane %v995_v10, %v2898_v26 }
 0x384   : > { %v1441_v22 = vpop.xlane.xlu0 %1440 }
 0x385   : > { %v1447_v61 = vsub.f32 %v1430_v1, %v1441_v22 }
 0x387   : > { %v1453_v63 = vmul.f32 1.442695, %v1447_v61 }
 0x388   : > { %v1444_v24 = vpop.xlane.xlu0 %1443 }
 0x389   : > { %2616 = vpow2.f32 %v1453_v63  ;;  %v1448_v25 = vsub.f32 %v1431_v7, %v1444_v24 }
 0x38b   : > { %v2613_v27 = vpop.eup %2612  ;;  %v1455_v28 = vmul.f32 1.442695, %v1448_v25 }
 0x38c   : > { %v2615_v15 = vpop.eup %2614  ;;  %v988_v30 = vpop.permute.xlu0 %987  ;;  %v1457_v31 = vsel %vm1432_vm4, %v2613_v27, 0.0 }
 0x38d   : > { %2618 = vpow2.f32 %v1455_v28  ;;  %v1010_v32 = vcombine.high %v988_v30, %v2725_v3  ;;  %v1017_v33 = vrot.slane %v988_v30, %v2898_v26  ;;  %1458 = vadd.xlane.f32.xlu1 %v1457_v31  ;;  %v1460_v35 = vsel %vm1432_vm4, %v2615_v15, 0.0 }
 0x38e   : > { %1461 = vadd.xlane.f32.xlu0 %v1460_v35 }
 0x38f   : > { %v1024_v37 = vrot.slane %v1010_v32, %v2898_v26  ;;  %v1025_v38 = vcombine.low %v1002_v29, %v1017_v33  ;;  %v1026_v39 = vcombine.high %v1002_v29, %v1017_v33 }
 0x391   : > { %v1033_v40 = vrot.slane %v1025_v38, %v2906_v34  ;;  %v1040_v41 = vrot.slane %v1026_v39, %v2906_v34  ;;  %v1041_v42 = vcombine.low %v1009_v36, %v1024_v37  ;;  %v1042_v43 = vcombine.high %v1009_v36, %v1024_v37 }
 0x393   : > { %v3022_v44 = vpop.eup %2616  ;;  %v1049_v45 = vrot.slane %v1041_v42, %v2906_v34  ;;  %v1056_v46 = vrot.slane %v1042_v43, %v2906_v34  ;;  %v1127_v47 = vcombine.low %v1033_v40, %v1040_v41  ;;  %v2385_v48 = vcombine.high %v1033_v40, %v1040_v41 }
 0x394   : > { %v1463_v49 = vsel %vm1432_vm4, %v3022_v44, 0.0 }
 0x395   : > { %v1134_v50 = vrot.slane %v1127_v47, %v2898_v26  ;;  %v1142_v51 = vrot.slane %v2385_v48, %v2898_v26  ;;  %v1143_v52 = vcombine.low %v1049_v45, %v1056_v46  ;;  %v2386_v53 = vcombine.high %v1049_v45, %v1056_v46  ;;  %1464 = vadd.xlane.f32.xlu1 %v1463_v49 }
 0x397   : > { %v3030_v54 = vpop.eup %2618  ;;  %v1150_v56 = vrot.slane %v1143_v52, %v2898_v26  ;;  %v1158_v57 = vrot.slane %v2386_v53, %v2898_v26  ;;  %v1159_v58 = vcombine.low %v1134_v50, %v1142_v51 }
 0x398   : > { %v1466_v60 = vsel %vm1432_vm4, %v3030_v54, 0.0 }
 0x399   : > { %1467 = vadd.xlane.f32.xlu0 %v1466_v60  ;;  %v1167_v62 = vcombine.low %v1150_v56, %v1158_v57  ;;  %v1166_v0 = vrot.slane %v1159_v58, %v2906_v34 }
 0x39b   : > { %v1174_v1 = vrot.slane %v1167_v62, %v2906_v34 }
 0x39d   : > { %v1175_v55 = vcombine.low %v1166_v0, %v1174_v1  ;;  %v1176_v59 = vcombine.high %v1166_v0, %v1174_v1 }
 0x39f   : > { %v1227_v2 = vpack.c.bf16 %v1175_v55, %v1175_v55  ;;  %v1228_v4 = vpack.c.bf16 %v1176_v59, %v1176_v59 }
 0x3a1   : > { %v1486_v7 = vsel %vm1484_vm5, %v1227_v2, 0  ;;  %v1532_v8 = vsel %vm1484_vm5, %v1228_v4, 0 }
 0x3a2   : > { %2493 = vmatpush3.bf16.msra.mxu1 %v1486_v7  ;;  %2499 = vmatpush3.bf16.msra.mxu0 %v1532_v8 }
 0x3a3   : > { %2504 = vmatprep.subr.bf16.mxu1 %v2725_v3  ;;  %2510 = vmatprep.subr.bf16.mxu0 %v2725_v3 }
 0x3a6   : > { %985 = vrot.lane.b32.xlu1 %v2884_v14, %s2731_s14 }
 0x3af   : > { %989 = vrot.lane.b32.xlu0 %v2891_v16, %s2731_s14 }
 0x41a   : > { %v1459_v9 = vpop.xlane.xlu1 %1458 }
 0x41b   : > { %2620 = vrcp.f32 %v1459_v9  ;;  %v1462_v11 = vpop.xlane.xlu0 %1461 }
 0x41c   : > { %2622 = vrcp.f32 %v1462_v11 }
 0x422   : > { %v1465_v12 = vpop.xlane.xlu1 %1464 }
 0x423   : > { %2624 = vrcp.f32 %v1465_v12 }
 0x425   : > { %v2621_v13 = vpop.eup %2620 }
 0x426   : > { %v2623_v17 = vpop.eup %2622  ;;  %v1473_v18 = vmul.f32 %v2621_v13, %v2613_v27  ;;  %v986_v19 = vpop.permute.xlu1 %985 }
 0x427   : > { %v1468_v20 = vpop.xlane.xlu0 %1467  ;;  %v1474_v21 = vmul.f32 %v2623_v17, %v2615_v15  ;;  %v1061_v61 = vcombine.high %v986_v19, %v2725_v3  ;;  %v1068_v16 = vrot.slane %v986_v19, %v2898_v26 }
 0x428   : > { %v1477_v22 = vpack.c.bf16 %v1473_v18, %v1473_v18  ;;  %2626 = vrcp.f32 %v1468_v20 }
 0x429   : > { %v1478_v63 = vpack.c.bf16 %v1474_v21, %v1474_v21  ;;  %v1075_v25 = vrot.slane %v1061_v61, %v2898_v26 }
 0x42a   : > { %2495 = vmatmul.mubr.msk.bf16.vlgmr.msra.gmra.mrb[8].mxu1 %vm1432_vm4, %v1477_v22 }
 0x42b   : > { %v990_v14 = vpop.permute.xlu0 %989  ;;  %2501 = vmatmul.mubr.msk.bf16.vlgmr.msra.gmra.mrb[12].mxu0 %vm1432_vm4, %v1478_v63  ;;  %2506 = vmatprep.mubr.msk.bf16.mxu1 %vm2726_vm1, %v2725_v3 }
 0x42c   : > { %v1076_v23 = vcombine.high %v990_v14, %v2725_v3  ;;  %v1083_v24 = vrot.slane %v990_v14, %v2898_v26  ;;  %2512 = vmatprep.mubr.msk.bf16.mxu0 %vm2726_vm1, %v2725_v3 }
 0x42d   : > { %v2625_v46 = vpop.eup %2624 }
 0x42e   : > { %v1090_v27 = vrot.slane %v1076_v23, %v2898_v26  ;;  %v1091_v10 = vcombine.low %v1068_v16, %v1083_v24  ;;  %v1092_v28 = vcombine.high %v1068_v16, %v1083_v24  ;;  %v1475_v52 = vmul.f32 %v2625_v46, %v3022_v44  ;;  %v2604_v44 = vld [vmem:[%s2844_s29] sm:$0xff]  }
 0x430   : > { %v1099_v15 = vrot.slane %v1091_v10, %v2906_v34  ;;  %v1106_v29 = vrot.slane %v1092_v28, %v2906_v34  ;;  %v1107_v30 = vcombine.low %v1075_v25, %v1090_v27  ;;  %v1108_v31 = vcombine.high %v1075_v25, %v1090_v27 }
 0x431   : > { %v1479_v62 = vpack.c.bf16 %v1475_v52, %v1475_v52 }
 0x432   : > { %v1115_v32 = vrot.slane %v1107_v30, %v2906_v34  ;;  %v1122_v33 = vrot.slane %v1108_v31, %v2906_v34  ;;  %v1177_v35 = vcombine.low %v1099_v15, %v1106_v29  ;;  %v2387_v36 = vcombine.high %v1099_v15, %v1106_v29  ;;  %v2627_v49 = vpop.eup %2626 }
 0x433   : > { %v1476_v53 = vmul.f32 %v2627_v49, %v3030_v54 }
 0x434   : > { %v1184_v37 = vrot.slane %v1177_v35, %v2898_v26  ;;  %v1192_v38 = vrot.slane %v2387_v36, %v2898_v26  ;;  %v1193_v39 = vcombine.low %v1115_v32, %v1122_v33  ;;  %v2388_v40 = vcombine.high %v1115_v32, %v1122_v33 }
 0x435   : > { %v1480_v0 = vpack.c.bf16 %v1476_v53, %v1476_v53 }
 0x436   : > { %v1200_v41 = vrot.slane %v1193_v39, %v2898_v26  ;;  %v1208_v42 = vrot.slane %v2388_v40, %v2898_v26  ;;  %v1209_v43 = vcombine.low %v1184_v37, %v1192_v38 }
 0x438   : > { %v1217_v45 = vcombine.low %v1200_v41, %v1208_v42  ;;  %v1216_v47 = vrot.slane %v1209_v43, %v2906_v34 }
 0x43a   : > { %v1224_v48 = vrot.slane %v1217_v45, %v2906_v34 }
 0x43c   : > { %v1225_v50 = vcombine.low %v1216_v47, %v1224_v48  ;;  %v1226_v51 = vcombine.high %v1216_v47, %v1224_v48 }
 0x43e   : > { %v1229_v56 = vpack.c.bf16 %v1225_v50, %v1225_v50  ;;  %v1230_v57 = vpack.c.bf16 %v1226_v51, %v1226_v51 }
 0x440   : > { %v1578_v58 = vsel %vm1484_vm5, %v1229_v56, 0  ;;  %v1624_v60 = vsel %vm1484_vm5, %v1230_v57, 0 }
 0x441   : > { %2505 = vmatpush3.bf16.msra.mxu1 %v1578_v58  ;;  %2511 = vmatpush3.bf16.msra.mxu0 %v1624_v60 }
 0x442   : > { %2516 = vmatprep.subr.bf16.mxu1 %v2725_v3  ;;  %2524 = vmatprep.subr.bf16.mxu0 %v2725_v3 }
 0x444   : > { %2507 = vmatmul.mubr.msk.bf16.vlgmr.msra.gmra.mrb[12].mxu1 %vm1432_vm4, %v1479_v62  ;;  %2513 = vmatmul.mubr.msk.bf16.vlgmr.msra.gmra.mrb[16].mxu0 %vm1432_vm4, %v1480_v0 }
 0x445   : > { %2520 = vmatprep.mubr.msk.bf16.mxu1 %vm2726_vm1, %v2725_v3  ;;  %2528 = vmatprep.mubr.msk.bf16.mxu0 %vm2726_vm1, %v2725_v3 }
 0x446   : > { %2517 = vmatpush3.bf16.msra.mxu1 %v2604_v44 }
 0x447   : > { %2518 = vmatprep.subr.bf16.mxu1 %v2725_v3 }
 0x4fd   : > { %v1522_v54 = vpop.f32.mrb[8].mxu1 }
 0x4fe   : > { %v1666_v1 = vcombine.high %v1522_v54, %v2725_v3  ;;  %v1673_v55 = vrot.slane %v1522_v54, %v2898_v26  ;;  %v1568_v59 = vpop.f32.mrb[12].mxu0  ;;  %v2496_v2 = vpop.f32.mrb[9].mxu1 }
 0x4ff   : > { %v1681_v4 = vcombine.high %v1568_v59, %v2725_v3  ;;  %v1688_v7 = vrot.slane %v1568_v59, %v2898_v26  ;;  %v2502_v8 = vpop.f32.mrb[13].mxu0  ;;  %v1525_v9 = vpop.f32.mrb[10].mxu1 }
 0x500   : > { %v1680_v11 = vrot.slane %v1666_v1, %v2898_v26  ;;  %v1571_v12 = vpop.f32.mrb[14].mxu0  ;;  %v2497_v13 = vpop.f32.mrb[11].mxu1 }
 0x501   : > { %v1695_v17 = vrot.slane %v1681_v4, %v2898_v26  ;;  %v1696_v18 = vcombine.low %v1673_v55, %v1688_v7  ;;  %v1697_v19 = vcombine.high %v1673_v55, %v1688_v7  ;;  %v2503_v20 = vpop.f32.mrb[15].mxu0  ;;  %v2605_v4 = vld [vmem:[%s2844_s29 + $0x8] sm:$0xff]  }
 0x502   : > { %2519 = vmatpush3.bf16.msra.mxu1 %v2605_v4  ;;  %v2611_v4 = vld [vmem:[%s2854_s19 + $0x18] sm:$0xff]  }
 0x503   : > { %v1704_v21 = vrot.slane %v1696_v18, %v2906_v34  ;;  %v1711_v22 = vrot.slane %v1697_v19, %v2906_v34  ;;  %v1712_v61 = vcombine.low %v1680_v11, %v1695_v17  ;;  %v1713_v63 = vcombine.high %v1680_v11, %v1695_v17  ;;  %2532 = vmatprep.subr.bf16.mxu1 %v2725_v3 }
 0x505   : > { %v1720_v14 = vrot.slane %v1712_v61, %v2906_v34  ;;  %v1727_v16 = vrot.slane %v1713_v63, %v2906_v34  ;;  %v1798_v23 = vcombine.low %v1704_v21, %v1711_v22  ;;  %v2399_v24 = vcombine.high %v1704_v21, %v1711_v22 }
 0x507   : > { %v1805_v25 = vrot.slane %v1798_v23, %v2898_v26  ;;  %v1813_v27 = vrot.slane %v2399_v24, %v2898_v26  ;;  %v1814_v10 = vcombine.low %v1720_v14, %v1727_v16  ;;  %v2400_v28 = vcombine.high %v1720_v14, %v1727_v16 }
 0x509   : > { %v1821_v15 = vrot.slane %v1814_v10, %v2898_v26  ;;  %v1829_v29 = vrot.slane %v2400_v28, %v2898_v26  ;;  %v1830_v30 = vcombine.low %v1805_v25, %v1813_v27 }
 0x50b   : > { %v1838_v31 = vcombine.low %v1821_v15, %v1829_v29  ;;  %v1837_v32 = vrot.slane %v1830_v30, %v2906_v34 }
 0x50d   : > { %v1845_v33 = vrot.slane %v1838_v31, %v2906_v34 }
 0x50f   : > { %v1846_v35 = vcombine.low %v1837_v32, %v1845_v33  ;;  %v1847_v36 = vcombine.high %v1837_v32, %v1845_v33  ;;  %v2606_v33 = vld [vmem:[%s2849_s30] sm:$0xff]  }
 0x510   : > { %2525 = vmatpush3.bf16.msra.mxu0 %v2606_v33 }
 0x511   : > { %2526 = vmatprep.subr.bf16.mxu0 %v2725_v3 }
 0x517   : > { %v1614_v37 = vpop.f32.mrb[12].mxu1  ;;  %v1660_v38 = vpop.f32.mrb[16].mxu0 }
 0x518   : > { %v1732_v39 = vcombine.high %v1614_v37, %v2725_v3  ;;  %v1739_v40 = vrot.slane %v1614_v37, %v2898_v26  ;;  %v1747_v41 = vcombine.high %v1660_v38, %v2725_v3  ;;  %v1754_v42 = vrot.slane %v1660_v38, %v2898_v26  ;;  %v2508_v43 = vpop.f32.mrb[13].mxu1  ;;  %v2514_v45 = vpop.f32.mrb[17].mxu0 }
 0x519   : > { %v1617_v46 = vpop.f32.mrb[14].mxu1  ;;  %v1663_v47 = vpop.f32.mrb[18].mxu0 }
 0x51a   : > { %v1746_v48 = vrot.slane %v1732_v39, %v2898_v26  ;;  %v1761_v49 = vrot.slane %v1747_v41, %v2898_v26  ;;  %v1762_v50 = vcombine.low %v1739_v40, %v1754_v42  ;;  %v1763_v51 = vcombine.high %v1739_v40, %v1754_v42  ;;  %v2509_v52 = vpop.f32.mrb[15].mxu1  ;;  %v2515_v53 = vpop.f32.mrb[19].mxu0 }
 0x51c   : > { %v1770_v56 = vrot.slane %v1762_v50, %v2906_v34  ;;  %v1777_v57 = vrot.slane %v1763_v51, %v2906_v34  ;;  %v1778_v58 = vcombine.low %v1746_v48, %v1761_v49  ;;  %v1779_v60 = vcombine.high %v1746_v48, %v1761_v49 }
 0x51e   : > { %v1786_v62 = vrot.slane %v1778_v58, %v2906_v34  ;;  %v1793_v0 = vrot.slane %v1779_v60, %v2906_v34  ;;  %v1848_v44 = vcombine.low %v1770_v56, %v1777_v57  ;;  %v2401_v54 = vcombine.high %v1770_v56, %v1777_v57  ;;  %v2407_v56 = vld [vmem:[%s2859_s10 + $0x2] ss:$0 sm:$0xff] }
 0x520   : > { %v1855_v1 = vrot.slane %v1848_v44, %v2898_v26  ;;  %v1863_v55 = vrot.slane %v2401_v54, %v2898_v26  ;;  %v1864_v59 = vcombine.low %v1786_v62, %v1793_v0  ;;  %v2402_v2 = vcombine.high %v1786_v62, %v1793_v0  ;;  %v2408_v44 = vld [vmem:[%s2859_s10 + $0x3] ss:$0 sm:$0xff] }
 0x522   : > { %v1871_v7 = vrot.slane %v1864_v59, %v2898_v26  ;;  %v1879_v8 = vrot.slane %v2402_v2, %v2898_v26  ;;  %v1880_v9 = vcombine.low %v1855_v1, %v1863_v55  ;;  %v2610_v2 = vld [vmem:[%s2854_s19 + $0x10] sm:$0xff]  }
 0x524   : > { %v1888_v11 = vcombine.low %v1871_v7, %v1879_v8  ;;  %v1887_v12 = vrot.slane %v1880_v9, %v2906_v34  ;;  %v2409_v7 = vld [vmem:[%s2859_s10 + $0x4] ss:$0 sm:$0xff] }
 0x526   : > { %v1895_v13 = vrot.slane %v1888_v11, %v2906_v34  ;;  %v2403_v34 = vld [vmem:[%s2859_s10 + $0x1] ss:$0 sm:$0xff] }
 0x528   : > { %v1897_v17 = vcombine.high %v1887_v12, %v1895_v13  ;;  %v1896_v18 = vcombine.low %v1887_v12, %v1895_v13 }
 0x52a   : > { %v2597_v19 = vpack.i.bf16 %v1897_v17, %v1847_v36  ;;  %v2609_v36 = vld [vmem:[%s2854_s19 + $0x8] sm:$0xff]  }
 0x52c   : > { %2598 = vrot.lane.b32.xlu1 %v2597_v19, %s2732_s15 }
 0x59e   : > { %v2599_v20 = vpop.permute.xlu1 %2598 }
 0x59f   : > { %v2601_v21 = vunpack.i.h.bf16 %v2599_v20  ;;  %v2600_v22 = vunpack.i.l.bf16 %v2599_v20 }
 0x5a1   : > { %v1906_v26 = vsel %vm1231_vm3, %v1846_v35, %v2600_v22  ;;  %v1907_v61 = vsel %vm1231_vm3, %v1896_v18, %v2601_v21  ;;  %v2607_v35 = vld [vmem:[%s2849_s30 + $0x8] sm:$0xff]   ;;  %v2413_v21 = vld [vmem:[%s2859_s10 + $0x5] ss:$0 sm:$0xff] }
 0x5a2   : > { %v1908_v63 = vpack.c.bf16 %v1907_v61, %v1906_v26  ;;  %2527 = vmatpush3.bf16.msra.mxu0 %v2607_v35 }
 0x5a4   : > { %2521 = vmatmul.mubr.msk.bf16.vlgmr.msra.gmra.mrb[16].mxu1 %vm446_vm2, %v1908_v63 }
 0x5a5   : > { %2540 = vmatprep.mubr.msk.bf16.mxu1 %vm2726_vm1, %v2725_v3 }
 0x677   : > { %v1966_v14 = vpop.f32.mrb[16].mxu1 }
 0x678   : > { %v1967_v16 = vadd.f32 %v2403_v34, %v1966_v14  ;;  %v2522_v23 = vpop.f32.mrb[17].mxu1 }
 0x679   : > { %v1969_v24 = vpop.f32.mrb[18].mxu1 }
 0x67a   : > { %v1973_v25 = vadd.f32 %v1967_v16, %v2866_v5  ;;  %v1970_v27 = vadd.f32 %v2403_v34, %v1969_v24  ;;  %v2523_v10 = vpop.f32.mrb[19].mxu1 }
 0x67c   : > { %v1974_v28 = vadd.f32 %v1970_v27, %v2868_v6  ;;  %v1975_v15 = vsel %vm446_vm2, %v1973_v25, 0.0  ;;  %v1984_v31 = vmul.f32 %v1973_v25, %v1973_v25  ;;  %v2608_v6 = vld [vmem:[%s2854_s19] sm:$0xff]  }
 0x67d   : > { %1976 = vadd.xlane.f32.xlu1 %v1975_v15  ;;  %2533 = vmatpush3.bf16.msra.mxu1 %v2608_v6 }
 0x67e   : > { %v1978_v29 = vsel %vm446_vm2, %v1974_v28, 0.0  ;;  %v1985_v30 = vmul.f32 %v1974_v28, %v1974_v28  ;;  %v1986_v5 = vsel %vm446_vm2, %v1984_v31, 0.0  ;;  %2534 = vmatprep.subr.bf16.mxu1 %v2725_v3 }
 0x67f   : > { %1979 = vadd.xlane.f32.xlu0 %v1978_v29 }
 0x680   : > { %v1989_v32 = vsel %vm446_vm2, %v1985_v30, 0.0 }
 0x681   : > { %1990 = vadd.xlane.f32.xlu1 %v1989_v32  ;;  %2535 = vmatpush3.bf16.msra.mxu1 %v2609_v36 }
 0x682   : > { %2536 = vmatprep.subr.bf16.mxu1 %v2725_v3 }
 0x683   : > { %1987 = vadd.xlane.f32.xlu0 %v1986_v5 }
 0x685   : > { %2537 = vmatpush3.bf16.msra.mxu1 %v2610_v2 }
 0x686   : > { %2538 = vmatprep.subr.bf16.mxu1 %v2725_v3 }
 0x689   : > { %2539 = vmatpush3.bf16.msra.mxu1 %v2611_v4 }
 0x70a   : > { %v1977_v37 = vpop.xlane.xlu1 %1976 }
 0x70b   : > { %v1982_v39 = vmul.f32 0.03125, %v1977_v37 }
 0x70c   : > { %v1980_v38 = vpop.xlane.xlu0 %1979 }
 0x70d   : > { %v1983_v40 = vmul.f32 0.03125, %v1980_v38  ;;  %v1994_v46 = vmul.f32 %v1982_v39, %v1982_v39  ;;  %v1998_v57 = vsub.f32 %v1973_v25, %v1982_v39 }
 0x70e   : > { %v1991_v41 = vpop.xlane.xlu1 %1990 }
 0x70f   : > { %v1995_v42 = vmul.f32 %v1983_v40, %v1983_v40  ;;  %v1993_v43 = vmul.f32 0.03125, %v1991_v41  ;;  %v1999_v52 = vsub.f32 %v1974_v28, %v1983_v40 }
 0x710   : > { %v1988_v45 = vpop.xlane.xlu0 %1987 }
 0x711   : > { %v1997_v47 = vsub.f32 %v1993_v43, %v1995_v42  ;;  %v1992_v48 = vmul.f32 0.03125, %v1988_v45  ;;  %v2419_v43 = vld [vmem:[%s2859_s10 + $0x6] ss:$0 sm:$0xff] }
 0x713   : > { %v2001_v49 = vadd.f32 1e-12, %v1997_v47  ;;  %v1996_v50 = vsub.f32 %v1992_v48, %v1994_v46  ;;  %v2420_v48 = vld [vmem:[%s2859_s10 + $0x7] ss:$0 sm:$0xff] }
 0x715   : > { %2628 = vrsqrt.f32 %v2001_v49  ;;  %v2000_v51 = vadd.f32 1e-12, %v1996_v50 }
 0x717   : > { %2630 = vrsqrt.f32 %v2000_v51 }
 0x71f   : > { %v2629_v53 = vpop.eup %2628 }
 0x720   : > { %v2005_v58 = vmul.f32 %v2629_v53, %v1999_v52 }
 0x721   : > { %v2631_v60 = vpop.eup %2630 }
 0x722   : > { %v2004_v62 = vmul.f32 %v2631_v60, %v1998_v57  ;;  %v2011_v0 = vmul.f32 %v2407_v56, %v2005_v58 }
 0x724   : > { %v2010_v54 = vmul.f32 %v2407_v56, %v2004_v62  ;;  %v2017_v55 = vadd.f32 %v2408_v44, %v2011_v0 }
 0x726   : > { %v2016_v1 = vadd.f32 %v2408_v44, %v2010_v54 }
 0x728   : > { %v2018_v59 = vpack.c.bf16 %v2017_v55, %v2016_v1 }
 0x72a   : > { %2529 = vmatmul.mubr.msk.bf16.vlgmr.msra.gmra.mrb[20].mxu0 %vm446_vm2, %v2018_v59 }
 0x7fd   : > { %v2076_v8 = vpop.f32.mrb[20].mxu0 }
 0x7fe   : > { %v2077_v9 = vadd.f32 %v2409_v7, %v2076_v8  ;;  %v2530_v11 = vpop.f32.mrb[21].mxu0 }
 0x7ff   : > { %v2079_v12 = vpop.f32.mrb[22].mxu0 }
 0x800   : > { %v2080_v13 = vadd.f32 %v2409_v7, %v2079_v12  ;;  %v2531_v17 = vpop.f32.mrb[23].mxu0  ;;  %v2083_v18 = vmax.f32 %v2077_v9, 0.0 }
 0x802   : > { %v2084_v19 = vmax.f32 %v2080_v13, 0.0 }
 0x804   : > { %v2085_v20 = vpack.c.bf16 %v2084_v19, %v2083_v18 }
 0x806   : > { %2541 = vmatmul.mubr.msk.bf16.vlgmr.msra.gmra.mrb[20].mxu1 %vm2122_vm6, %v2085_v20 }
 0x8d9   : > { %v2160_v22 = vpop.f32.mrb[20].mxu1 }
 0x8da   : > { %v2161_v26 = vadd.f32 %v2413_v21, %v2160_v22  ;;  %v2542_v61 = vpop.f32.mrb[21].mxu1 }
 0x8db   : > { %v2163_v63 = vpop.f32.mrb[22].mxu1 }
 0x8dc   : > { %v2167_v3 = vadd.f32 %v2161_v26, %v2016_v1  ;;  %v2164_v34 = vadd.f32 %v2413_v21, %v2163_v63  ;;  %v2543_v14 = vpop.f32.mrb[23].mxu1 }
 0x8de   : > { %v2168_v16 = vadd.f32 %v2164_v34, %v2017_v55  ;;  %v2169_v23 = vsel %vm446_vm2, %v2167_v3, 0.0  ;;  %v2177_v24 = vmul.f32 %v2167_v3, %v2167_v3 }
 0x8df   : > { %2170 = vadd.xlane.f32.xlu0 %v2169_v23 }
 0x8e0   : > { %v2172_v25 = vsel %vm446_vm2, %v2168_v16, 0.0  ;;  %v2178_v27 = vmul.f32 %v2168_v16, %v2168_v16  ;;  %v2179_v10 = vsel %vm446_vm2, %v2177_v24, 0.0 }
 0x8e1   : > { %2173 = vadd.xlane.f32.xlu1 %v2172_v25 }
 0x8e2   : > { %v2182_v28 = vsel %vm446_vm2, %v2178_v27, 0.0 }
 0x8e3   : > { %2180 = vadd.xlane.f32.xlu0 %v2179_v10 }
 0x8e5   : > { %2183 = vadd.xlane.f32.xlu1 %v2182_v28 }
 0x96c   : > { %v2171_v15 = vpop.xlane.xlu0 %2170 }
 0x96d   : > { %v2175_v29 = vmul.f32 0.03125, %v2171_v15 }
 0x96e   : > { %v2174_v30 = vpop.xlane.xlu1 %2173 }
 0x96f   : > { %v2176_v31 = vmul.f32 0.03125, %v2174_v30  ;;  %v2187_v5 = vmul.f32 %v2175_v29, %v2175_v29  ;;  %v2191_v41 = vsub.f32 %v2167_v3, %v2175_v29 }
 0x970   : > { %v2181_v32 = vpop.xlane.xlu0 %2180 }
 0x971   : > { %v2185_v33 = vmul.f32 0.03125, %v2181_v32  ;;  %v2188_v6 = vmul.f32 %v2176_v31, %v2176_v31  ;;  %v2192_v45 = vsub.f32 %v2168_v16, %v2176_v31 }
 0x972   : > { %v2184_v35 = vpop.xlane.xlu1 %2183 }
 0x973   : > { %v2189_v36 = vsub.f32 %v2185_v33, %v2187_v5  ;;  %v2186_v37 = vmul.f32 0.03125, %v2184_v35 }
 0x975   : > { %v2193_v38 = vadd.f32 1e-12, %v2189_v36  ;;  %v2190_v39 = vsub.f32 %v2186_v37, %v2188_v6 }
 0x977   : > { %2632 = vrsqrt.f32 %v2193_v38  ;;  %v2194_v40 = vadd.f32 1e-12, %v2190_v39 }
 0x979   : > { %2634 = vrsqrt.f32 %v2194_v40 }
 0x981   : > { %v2633_v42 = vpop.eup %2632 }
 0x982   : > { %v2197_v46 = vmul.f32 %v2633_v42, %v2191_v41 }
 0x983   : > { %v2635_v47 = vpop.eup %2634 }
 0x984   : > { %v2203_v49 = vmul.f32 %v2419_v43, %v2197_v46  ;;  %v2198_v50 = vmul.f32 %v2635_v47, %v2192_v45  ;;  %2216 = sbr.rel (%p2421_p6) target bundleno = 2444 (0x98c), region = 60 }
 0x986   : > { %v2209_v51 = vadd.f32 %v2420_v48, %v2203_v49  ;;  %v2204_v52 = vmul.f32 %v2419_v43, %v2198_v50 }
 0x988   : > { %2211 = vst.msk [vmem:[#allocation2] sm:$0xff] %vm446_vm2, %v2209_v51  ;;  %v2210_v53 = vadd.f32 %v2420_v48, %v2204_v52 }
 0x989   : > { %2218 = vst.msk [vmem:[#allocation6] sm:$0x1] (!%p2421_p6), %vm2217_vm7, %v2209_v51 }
 0x98a   : > { %2212 = vst.msk [vmem:[#allocation2 + $0x8] sm:$0xff] %vm446_vm2, %v2210_v53 }
 0x98b   : > { %2219 = vst.msk [vmem:[#allocation6 + $0x1] sm:$0x1] %vm2217_vm7, %v2210_v53 }
 0x98c PF: > { %p3155_p8 = scmp.eq.s32.totalorder %s2356_s27, 1  ;;  %s2733_s16 = smov [#allocation6]  }
 0x98d   : > { %s2229_s30 = sshll.u32 %s2733_s16, 4  ;;  %s2230_s30 = int_to_ptr.vmem [resolvable:$true] %s2229_s30 }
 0x98e   : > { %s2664_s17 = scalar_lea.vmem %s2230_s30, 32  ;;  %p2671_p13 = scmp.lt.s32.totalorder %s2230_s30, %s2230_s30 }
 0x98f   : > { %p2665_p10 = scmp.ne.s32.totalorder %s2230_s30, %s2664_s17  ;;  %p2672_p0 = scmp.lt.s32.totalorder %s2664_s17, %s2664_s17 }
 0x991   : > { %p2666_p11 = pnand %p2665_p10, %p3155_p8  ;;  %p2673_p1 = por %p2672_p0, %p2671_p13 }
 0x993   : > { %p2667_p12 = pneg %p2666_p11 }
 0x995   : > { %p2674_p2 = pnand %p2673_p1, %p2667_p12 }
 0x997   : > { %2677 = shalt.err (!%p2674_p2)
}
 0x998   : > { %s2678_s27 = scalar_lea.hbm %s3199_s7, 32 }
 0x999   : > { %p2679_p5 = scmp.ne.s32.totalorder %s3199_s7, %s2678_s27  ;;  %p2684_p3 = scmp.lt.u32.totalorder %s2678_s27, %s3199_s7 }
 0x99b   : > { %p2680_p7 = pnand %p2679_p5, %p3155_p8 }
 0x99d   : > { %p2681_p9 = pneg %p2680_p7 }
 0x99f   : > { %p2686_p4 = pnand %p2684_p3, %p2681_p9 }
 0x9a1   : > { %2689 = shalt.err (!%p2686_p4)
}
 0x9a2   : > { %s2734_s10 = smov 1  }
 0x9a3   : > { %2549 = dma.vmem_to_hbm [thread:$0]  (%p3155_p8), %s2230_s30, 32, %s3199_s7, [#allocation5], %s2732_s15, %s2732_s15, %s2734_s10  }
 0x9a4   : > { %2707 = dma.done.wait (%p3155_p8), [#allocation5], 32  }
 0x9a5   : > { %2709 = vsyncadd (%p3155_p8), [#allocation5], 4294967264 }
 0x9a6 PF: > { %s19_s26 = sadd.s32 1, %s2720_s26   ;;  %s3209_s24 = smov %s2716_s25 }
 0x9a7   : > { %p16_p6 = scmp.ge.s32.totalorder %s19_s26, 4   ;;  %s3210_s25 = smov %s3212_s28 }
 0x9a9   :  { %18 = sbr.rel (!%p16_p6) target bundleno = 3 (0x3), region = 105 }
 0x9b0   :  { %2245 = vsyncpa [#allocation4], 1 }
 0x9b1   :  { %2247 = vsyncpa [#allocation4 + $0x1], 1 }
 0x9b2   :  { %2248 = vsyncpa [#allocation5], 1 }
 0x9b3   :  { %2250 = vsyncpa [#allocation5 + $0x1], 1 }

</bundles_post_ra>
